<compile_context>
chip_gen: v6e
topology: v6e:2x2x1
jax: 0.10.0
libtpu: 0.0.40
codegen_flags: <defaults>
</compile_context>

<pallas_src>
import functools

import jax
import jax.numpy as jnp
from jax.experimental import pallas as pl
from jax.experimental.pallas import tpu as pltpu


def _deconv_prelu_kernel(xf_ref, w_ref, b_ref, alpha_ref, out_ref,
                         *, H, W, Cin, KP, PH, PAD):
    """One batch image per grid step.

    xf_ref:    (1, H*W + 2*PAD, Cin)  flattened (row-major HW) input, zero-padded
    w_ref:     (KP*KP*Cin, PH)        combined sub-pixel weight (PH = s*s*Cout)
    b_ref:     (1, PH)                per-phase bias
    alpha_ref: (1,)  SMEM             PReLU slope
    out_ref:   (1, H*W, PH)           phase-major output slab
    """
    HW = H * W

    # Column-validity masks for the left/right taps of the 3-wide window
    # (the flat shift wraps across image rows at c==0 / c==W-1).
    m = jax.lax.broadcasted_iota(jnp.int32, (HW, 1), 0)
    c = m % W
    left_ok = c != 0          # tap reads column c-1
    right_ok = c != (W - 1)   # tap reads column c+1

    # im2col: the 9 shifted views of the flattened input, concatenated along
    # lanes -> a single (H*W, 9*Cin) LHS for one big MXU dot (K=72 instead of
    # nine K=8 dots).
    cols = []
    for dy in range(KP):
        for dx in range(KP):
            off = PAD + (dy - 1) * W + (dx - 1)           # static offset
            piece = xf_ref[0, off:off + HW, :]            # (H*W, Cin)
            if dx == 0:
                piece = jnp.where(left_ok, piece, 0.0)
            elif dx == KP - 1:
                piece = jnp.where(right_ok, piece, 0.0)
            cols.append(piece)
    lhs = jnp.concatenate(cols, axis=-1)                  # (H*W, KP*KP*Cin)

    acc = jnp.dot(lhs, w_ref[...], preferred_element_type=jnp.float32)
    acc = acc + b_ref[...].astype(jnp.float32)            # bias (broadcast)

    a = alpha_ref[0]                                      # PReLU (fused)
    acc = jnp.where(acc >= 0, acc, a * acc)

    out_ref[0] = acc.astype(out_ref.dtype)


def deconv_block_forward(x_nchw, weight, bias, prelu_alpha, *, stride=2, padding=1):
    """PReLU(ConvTranspose2d(x)) with the DeconvBlock default hyper-parameters.

    x_nchw:      (N, Cin, H, W)        PyTorch NCHW input
    weight:      (Cin, Cout, K, K)     ConvTranspose2d weight layout
    bias:        (Cout,)
    prelu_alpha: (1,)                  PReLU slope (nn.PReLU default num_parameters=1)
    returns      (N, Cout, Ho, Wo), Ho = (H-1)*s - 2*p + K
    """
    N, Cin, H, W = x_nchw.shape
    Cin_w, Cout, K, K2 = weight.shape
    assert Cin == Cin_w and K == K2
    s, p = int(stride), int(padding)
    # Specialized sub-pixel path for the module defaults.
    assert K == 4 and s == 2 and p == 1, "only kernel_size=4, stride=2, padding=1"

    Ho = (H - 1) * s - 2 * p + K          # = 2*H
    Wo = (W - 1) * s - 2 * p + K          # = 2*W
    KP = K // s + 1                       # 3x3 coarse-space window
    PH = s * s * Cout                     # phases x Cout

    # ---- input prep (cheap wrapper glue, no dilated buffer) -----------------
    x_nhwc = jnp.transpose(x_nchw, (0, 2, 3, 1))                 # (N,H,W,Cin)
    xflat = x_nhwc.reshape(N, H * W, Cin)
    PAD = W + 1                                                  # covers +-(W+1) shifts
    xflat = jnp.pad(xflat, ((0, 0), (PAD, PAD), (0, 0)))

    # ---- combined sub-pixel weight ------------------------------------------
    # Wc[(dy*KP+dx)*Cin + ci, (py*s+px)*Cout + co] = weight[ci, co, kh, kw]
    #   with kh = py + (K-1) - s*dy (zero if out of [0,K)), same for kw.
    wc = jnp.zeros((KP * KP * Cin, PH), dtype=jnp.float32)
    for py in range(s):
        for dy in range(KP):
            kh = py + (K - 1) - s * dy
            if not (0 <= kh < K):
                continue
            for px in range(s):
                for dx in range(KP):
                    kw = px + (K - 1) - s * dx
                    if not (0 <= kw < K):
                        continue
                    r0 = (dy * KP + dx) * Cin
                    c0 = (py * s + px) * Cout
                    wc = wc.at[r0:r0 + Cin, c0:c0 + Cout].set(
                        weight[:, :, kh, kw].astype(jnp.float32))

    bphase = jnp.tile(bias.reshape(1, Cout).astype(jnp.float32), (1, s * s))  # (1, PH)
    alpha = prelu_alpha.reshape(1).astype(jnp.float32)

    # ---- pallas_call ---------------------------------------------------------
    flops = 2 * N * H * W * (KP * KP * Cin) * PH
    bytes_accessed = 4 * (int(xflat.size) + int(wc.size) + int(bphase.size)
                          + 1 + N * H * W * PH)
    cost = pl.CostEstimate(flops=flops, transcendentals=0,
                           bytes_accessed=bytes_accessed)

    out_flat = pl.pallas_call(
        functools.partial(_deconv_prelu_kernel,
                          H=H, W=W, Cin=Cin, KP=KP, PH=PH, PAD=PAD),
        out_shape=jax.ShapeDtypeStruct((N, H * W, PH), x_nchw.dtype),
        grid=(N,),
        in_specs=[
            pl.BlockSpec((1, H * W + 2 * PAD, Cin), lambda n: (n, 0, 0)),
            pl.BlockSpec((KP * KP * Cin, PH), lambda n: (0, 0)),
            pl.BlockSpec((1, PH), lambda n: (0, 0)),
            pl.BlockSpec(memory_space=pltpu.MemorySpace.SMEM),
        ],
        out_specs=pl.BlockSpec((1, H * W, PH), lambda n: (n, 0, 0)),
        compiler_params=pltpu.CompilerParams(
            dimension_semantics=("parallel",)),
        cost_estimate=cost,
    )(xflat, wc, bphase, alpha)

    # ---- phase -> pixel interleave + NCHW (wrapper-side layout plumbing) ----
    out = out_flat.reshape(N, H, W, s, s, Cout)          # [n, r, c, py, px, co]
    out = jnp.transpose(out, (0, 5, 1, 3, 2, 4))         # [n, co, r, py, c, px]
    return out.reshape(N, Cout, Ho, Wo)


def _ref_deconv_block(x, w, b, alpha, s, p):
    """Plain-JAX reference: PReLU(ConvTranspose2d(x)), NCHW."""
    N, Cin, H, W = x.shape
    _, Cout, K, _ = w.shape
    Hf = (H - 1) * s + K
    Wf = (W - 1) * s + K
    full = jnp.zeros((N, Cout, Hf, Wf), jnp.float32)
    for kh in range(K):
        for kw in range(K):
            contrib = jnp.einsum('nihw,io->nohw', x, w[:, :, kh, kw])
            full = full.at[:, :,
                           kh:kh + (H - 1) * s + 1:s,
                           kw:kw + (W - 1) * s + 1:s].add(contrib)
    out = full[:, :, p:Hf - p, p:Wf - p] + b[None, :, None, None]
    return jnp.where(out >= 0, out, alpha * out)


if __name__ == "__main__":
    # DeconvBlock(input_size=8, output_size=4) -> ConvTranspose2d(8, 4, 4, 2, 1) + PReLU
    N, Cin, H, W = 2, 8, 16, 16
    Cout, K, stride, padding = 4, 4, 2, 1

    key = jax.random.PRNGKey(0)
    kx, kw_, kb = jax.random.split(key, 3)
    x = jax.random.normal(kx, (N, Cin, H, W), dtype=jnp.float32)
    weight = jax.random.uniform(kw_, (Cin, Cout, K, K), jnp.float32,
                                minval=-0.1, maxval=0.1)
    bias = jax.random.uniform(kb, (Cout,), jnp.float32, minval=-0.1, maxval=0.1)
    alpha = jnp.array([0.25], dtype=jnp.float32)   # nn.PReLU() default init

    fn = jax.jit(functools.partial(deconv_block_forward,
                                   stride=stride, padding=padding))
    out = jax.block_until_ready(fn(x, weight, bias, alpha))

    ref = _ref_deconv_block(x, weight, bias, alpha[0], stride, padding)
    Ho = (H - 1) * stride - 2 * padding + K
    Wo = (W - 1) * stride - 2 * padding + K
    assert out.shape == (N, Cout, Ho, Wo), out.shape
    # Tolerance allows for MXU multi-pass f32 rounding differences between the
    # fused K=72 im2col dot and the per-tap reference einsum.
    err = float(jnp.max(jnp.abs(out - ref)))
    assert jnp.allclose(out, ref, rtol=1e-3, atol=1e-3), err

    print("KERNEL_OK")
</pallas_src>

<mosaic_0001>
module attributes {stable_mosaic.version = 11 : i64} {
  func.func @_deconv_prelu_kernel(%arg0: i32, %arg1: memref<1x290x8xf32, #tpu.memory_space<vmem>>, %arg2: memref<72x16xf32, #tpu.memory_space<vmem>>, %arg3: memref<1x16xf32, #tpu.memory_space<vmem>>, %arg4: memref<1xf32, #tpu.memory_space<smem>>, %arg5: memref<1x256x16xf32, #tpu.memory_space<vmem>>) attributes {dimension_semantics = [#tpu.dimension_semantics<parallel>], iteration_bounds = array<i64: 2>, scalar_prefetch = 0 : i64, scratch_operands = 0 : i64, tpu.core_type = #tpu.core_type<tc>, window_params = [{transform_indices = @transform_0, window_bounds = array<i64: 1, 290, 8>}, {pipeline_mode = #tpu.pipeline_mode<synchronous>, transform_indices = @transform_1, window_bounds = array<i64: 72, 16>}, {pipeline_mode = #tpu.pipeline_mode<synchronous>, transform_indices = @transform_2, window_bounds = array<i64: 1, 16>}, {transform_indices = @transform_3, window_bounds = array<i64: 1>}, {transform_indices = @transform_4, window_bounds = array<i64: 1, 256, 16>}]} {
    %0 = tpu.iota {dimensions = array<i32: 0>} : vector<256x1xi32>
    %c16_i32 = arith.constant 16 : i32
    %c0_i32 = arith.constant 0 : i32
    %1 = arith.cmpi eq, %c16_i32, %c0_i32 : i32
    %c1_i32 = arith.constant 1 : i32
    %2 = arith.select %1, %c1_i32, %c16_i32 : i32
    %3 = vector.broadcast %2 : i32 to vector<256x1xi32>
    %4 = arith.remsi %0, %3 : vector<256x1xi32>
    %c0_i32_0 = arith.constant 0 : i32
    %5 = vector.broadcast %c0_i32_0 : i32 to vector<256x1xi32>
    %6 = arith.cmpi ne, %4, %5 : vector<256x1xi32>
    %c0_i32_1 = arith.constant 0 : i32
    %7 = vector.broadcast %c0_i32_1 : i32 to vector<256x1xi32>
    %8 = arith.cmpi slt, %4, %7 : vector<256x1xi32>
    %c0_i32_2 = arith.constant 0 : i32
    %9 = arith.cmpi slt, %2, %c0_i32_2 : i32
    %10 = vector.broadcast %9 : i1 to vector<256x1xi1>
    %11 = vector.broadcast %10 : vector<256x1xi1> to vector<256x1xi1>
    %12 = arith.xori %8, %11 : vector<256x1xi1>
    %13 = arith.andi %12, %6 : vector<256x1xi1>
    %14 = vector.broadcast %2 : i32 to vector<256x1xi32>
    %15 = arith.addi %4, %14 : vector<256x1xi32>
    %16 = arith.select %13, %15, %4 : vector<256x1xi1>, vector<256x1xi32>
    %c0_i32_3 = arith.constant 0 : i32
    %17 = vector.broadcast %c0_i32_3 : i32 to vector<256x1xi32>
    %18 = arith.cmpi ne, %16, %17 : vector<256x1xi32>
    %c15_i32 = arith.constant 15 : i32
    %19 = vector.broadcast %c15_i32 : i32 to vector<256x1xi32>
    %20 = arith.cmpi ne, %16, %19 : vector<256x1xi32>
    %c0 = arith.constant 0 : index
    %c0_4 = arith.constant 0 : index
    %c0_5 = arith.constant 0 : index
    %21 = vector.load %arg1[%c0, %c0_4, %c0_5] : memref<1x290x8xf32, #tpu.memory_space<vmem>>, vector<1x256x8xf32>
    %22 = vector.shape_cast %21 : vector<1x256x8xf32> to vector<256x8xf32>
    %cst = arith.constant 0.000000e+00 : f32
    %23 = vector.shape_cast %18 : vector<256x1xi1> to vector<256x1xi1>
    %24 = vector.broadcast %23 : vector<256x1xi1> to vector<256x8xi1>
    %25 = vector.broadcast %cst : f32 to vector<256x8xf32>
    %26 = arith.select %24, %22, %25 : vector<256x8xi1>, vector<256x8xf32>
    %c0_6 = arith.constant 0 : index
    %c1 = arith.constant 1 : index
    %c0_7 = arith.constant 0 : index
    %27 = vector.load %arg1[%c0_6, %c1, %c0_7] : memref<1x290x8xf32, #tpu.memory_space<vmem>>, vector<1x256x8xf32>
    %28 = vector.shape_cast %27 : vector<1x256x8xf32> to vector<256x8xf32>
    %c0_8 = arith.constant 0 : index
    %c2 = arith.constant 2 : index
    %c0_9 = arith.constant 0 : index
    %29 = vector.load %arg1[%c0_8, %c2, %c0_9] : memref<1x290x8xf32, #tpu.memory_space<vmem>>, vector<1x256x8xf32>
    %30 = vector.shape_cast %29 : vector<1x256x8xf32> to vector<256x8xf32>
    %cst_10 = arith.constant 0.000000e+00 : f32
    %31 = vector.shape_cast %20 : vector<256x1xi1> to vector<256x1xi1>
    %32 = vector.broadcast %31 : vector<256x1xi1> to vector<256x8xi1>
    %33 = vector.broadcast %cst_10 : f32 to vector<256x8xf32>
    %34 = arith.select %32, %30, %33 : vector<256x8xi1>, vector<256x8xf32>
    %c0_11 = arith.constant 0 : index
    %c16 = arith.constant 16 : index
    %c0_12 = arith.constant 0 : index
    %35 = vector.load %arg1[%c0_11, %c16, %c0_12] : memref<1x290x8xf32, #tpu.memory_space<vmem>>, vector<1x256x8xf32>
    %36 = vector.shape_cast %35 : vector<1x256x8xf32> to vector<256x8xf32>
    %cst_13 = arith.constant 0.000000e+00 : f32
    %37 = vector.shape_cast %18 : vector<256x1xi1> to vector<256x1xi1>
    %38 = vector.broadcast %37 : vector<256x1xi1> to vector<256x8xi1>
    %39 = vector.broadcast %cst_13 : f32 to vector<256x8xf32>
    %40 = arith.select %38, %36, %39 : vector<256x8xi1>, vector<256x8xf32>
    %c0_14 = arith.constant 0 : index
    %c17 = arith.constant 17 : index
    %c0_15 = arith.constant 0 : index
    %41 = vector.load %arg1[%c0_14, %c17, %c0_15] : memref<1x290x8xf32, #tpu.memory_space<vmem>>, vector<1x256x8xf32>
    %42 = vector.shape_cast %41 : vector<1x256x8xf32> to vector<256x8xf32>
    %c0_16 = arith.constant 0 : index
    %c18 = arith.constant 18 : index
    %c0_17 = arith.constant 0 : index
    %43 = vector.load %arg1[%c0_16, %c18, %c0_17] : memref<1x290x8xf32, #tpu.memory_space<vmem>>, vector<1x256x8xf32>
    %44 = vector.shape_cast %43 : vector<1x256x8xf32> to vector<256x8xf32>
    %cst_18 = arith.constant 0.000000e+00 : f32
    %45 = vector.shape_cast %20 : vector<256x1xi1> to vector<256x1xi1>
    %46 = vector.broadcast %45 : vector<256x1xi1> to vector<256x8xi1>
    %47 = vector.broadcast %cst_18 : f32 to vector<256x8xf32>
    %48 = arith.select %46, %44, %47 : vector<256x8xi1>, vector<256x8xf32>
    %c0_19 = arith.constant 0 : index
    %c32 = arith.constant 32 : index
    %c0_20 = arith.constant 0 : index
    %49 = vector.load %arg1[%c0_19, %c32, %c0_20] : memref<1x290x8xf32, #tpu.memory_space<vmem>>, vector<1x256x8xf32>
    %50 = vector.shape_cast %49 : vector<1x256x8xf32> to vector<256x8xf32>
    %cst_21 = arith.constant 0.000000e+00 : f32
    %51 = vector.shape_cast %18 : vector<256x1xi1> to vector<256x1xi1>
    %52 = vector.broadcast %51 : vector<256x1xi1> to vector<256x8xi1>
    %53 = vector.broadcast %cst_21 : f32 to vector<256x8xf32>
    %54 = arith.select %52, %50, %53 : vector<256x8xi1>, vector<256x8xf32>
    %c0_22 = arith.constant 0 : index
    %c33 = arith.constant 33 : index
    %c0_23 = arith.constant 0 : index
    %55 = vector.load %arg1[%c0_22, %c33, %c0_23] : memref<1x290x8xf32, #tpu.memory_space<vmem>>, vector<1x256x8xf32>
    %56 = vector.shape_cast %55 : vector<1x256x8xf32> to vector<256x8xf32>
    %c0_24 = arith.constant 0 : index
    %c34 = arith.constant 34 : index
    %c0_25 = arith.constant 0 : index
    %57 = vector.load %arg1[%c0_24, %c34, %c0_25] : memref<1x290x8xf32, #tpu.memory_space<vmem>>, vector<1x256x8xf32>
    %58 = vector.shape_cast %57 : vector<1x256x8xf32> to vector<256x8xf32>
    %cst_26 = arith.constant 0.000000e+00 : f32
    %59 = vector.shape_cast %20 : vector<256x1xi1> to vector<256x1xi1>
    %60 = vector.broadcast %59 : vector<256x1xi1> to vector<256x8xi1>
    %61 = vector.broadcast %cst_26 : f32 to vector<256x8xf32>
    %62 = arith.select %60, %58, %61 : vector<256x8xi1>, vector<256x8xf32>
    %63 = tpu.concatenate %26, %28, %34, %40, %42, %48, %54, %56, %62 in 1 : vector<256x8xf32>, vector<256x8xf32>, vector<256x8xf32>, vector<256x8xf32>, vector<256x8xf32>, vector<256x8xf32>, vector<256x8xf32>, vector<256x8xf32>, vector<256x8xf32> -> vector<256x72xf32>
    %c0_27 = arith.constant 0 : index
    %c0_28 = arith.constant 0 : index
    %64 = vector.load %arg2[%c0_27, %c0_28] : memref<72x16xf32, #tpu.memory_space<vmem>>, vector<72x16xf32>
    %cst_29 = arith.constant dense<0.000000e+00> : vector<256x16xf32>
    %65 = tpu.matmul %63, %64, %cst_29 {dimension_numbers = #tpu.dot_dimension_numbers<[1], [0], [0], [1], [0, 0, 1, 1], [], []>} : vector<256x72xf32>, vector<72x16xf32>, vector<256x16xf32> -> vector<256x16xf32>
    %c0_30 = arith.constant 0 : index
    %c0_31 = arith.constant 0 : index
    %66 = vector.load %arg3[%c0_30, %c0_31] : memref<1x16xf32, #tpu.memory_space<vmem>>, vector<1x16xf32>
    %67 = vector.broadcast %66 : vector<1x16xf32> to vector<256x16xf32>
    %68 = arith.addf %65, %67 : vector<256x16xf32>
    %c0_32 = arith.constant 0 : index
    %69 = memref.load %arg4[%c0_32] : memref<1xf32, #tpu.memory_space<smem>>
    %cst_33 = arith.constant 0.000000e+00 : f32
    %70 = vector.broadcast %cst_33 : f32 to vector<256x16xf32>
    %71 = arith.cmpf oge, %68, %70 : vector<256x16xf32>
    %72 = vector.broadcast %69 : f32 to vector<256x16xf32>
    %73 = arith.mulf %72, %68 : vector<256x16xf32>
    %74 = arith.select %71, %68, %73 : vector<256x16xi1>, vector<256x16xf32>
    %c0_34 = arith.constant 0 : index
    %c0_35 = arith.constant 0 : index
    %c0_36 = arith.constant 0 : index
    %75 = vector.load %arg5[%c0_34, %c0_35, %c0_36] : memref<1x256x16xf32, #tpu.memory_space<vmem>>, vector<1x256x16xf32>
    %76 = vector.shape_cast %75 : vector<1x256x16xf32> to vector<256x16xf32>
    %77 = vector.shape_cast %74 : vector<256x16xf32> to vector<1x256x16xf32>
    tpu.vector_store %arg5[%c0_34, %c0_35, %c0_36], %77 {strides = array<i32>} : memref<1x256x16xf32, #tpu.memory_space<vmem>>, vector<1x256x16xf32>,
    return
  }
  func.func @transform_0(%arg0: i32) -> (i32, i32, i32) {
    %c0_i32 = arith.constant 0 : i32
    %c0_i32_0 = arith.constant 0 : i32
    %c0_i32_1 = arith.constant 0 : i32
    return %arg0, %c0_i32, %c0_i32_0 : i32, i32, i32
  }
  func.func @transform_1(%arg0: i32) -> (i32, i32) {
    %c0_i32 = arith.constant 0 : i32
    %c0_i32_0 = arith.constant 0 : i32
    %c0_i32_1 = arith.constant 0 : i32
    return %c0_i32, %c0_i32_0 : i32, i32
  }
  func.func @transform_2(%arg0: i32) -> (i32, i32) {
    %c0_i32 = arith.constant 0 : i32
    %c0_i32_0 = arith.constant 0 : i32
    %c0_i32_1 = arith.constant 0 : i32
    return %c0_i32, %c0_i32_0 : i32, i32
  }
  func.func @transform_3(%arg0: i32) -> i32 {
    %c0_i32 = arith.constant 0 : i32
    %c0_i32_0 = arith.constant 0 : i32
    return %c0_i32 : i32
  }
  func.func @transform_4(%arg0: i32) -> (i32, i32, i32) {
    %c0_i32 = arith.constant 0 : i32
    %c0_i32_0 = arith.constant 0 : i32
    %c0_i32_1 = arith.constant 0 : i32
    return %arg0, %c0_i32, %c0_i32_0 : i32, i32, i32
  }
}

</mosaic_0001>

<bundles_post_ra>
// kernel: deconv_block_forward.1
= control target key start
LH: loop header
LB: loop body
LE: loop exit
PB: predicated region body
PF: predicated region fallthrough
CT: control target
= control target key end

     0   :  { %s3142_s17 = smov 0   ;;  %s5072_s0 = inlined_call_operand.vmem [shape: f32[2,290,8], index: 0, kind: input, shape index: {}]   ;;  %s5073_s1 = inlined_call_operand.vmem [shape: f32[72,16], index: 1, kind: input, shape index: {}]   ;;  %s5074_s2 = inlined_call_operand.vmem [shape: f32[1,16], index: 2, kind: input, shape index: {}]   ;;  %s5075_s3 = inlined_call_operand.<no memory space> [shape: f32[1], index: 3, kind: input, shape index: {}]   ;;  %s5076_s4 = inlined_call_operand.vmem [shape: f32[2,256,16], index: 4, kind: output, shape index: {}]  }
   0x1   :  { %9 = sst [smem:[#allocation2]] %s5075_s3 }
   0x2 LB: > { %s2859_s18 = sadd.s32 4294967295, %s3104_s17   ;;  %p2863_p0 = scmp.ge.s32.totalorder %s3104_s17, 1  ;;  %s3104_s17 = sphi %s3142_s17, %s15_s17  }
   0x3   : > { %p163_p1 = scmp.lt.s32.totalorder %s3104_s17, 3 }
   0x5   : > { %p164_p2 = pnand %p2863_p0, %p163_p1 }
   0x7   : > { %167 = sbr.rel (%p164_p2) target bundleno = 846 (0x34e), region = 36 }
   0xc   : > { %p189_p3 = scmp.lt.s32.totalorder %s2859_s18, 1  ;;  %s3106_s22 = smov 8   ;;  %v199_v24 = vlaneseq  ;;  %v5209_v43 = vmov 0  ;;  %v5212_v49 = vmov 0  ;;  %v5215_v55 = vmov 0 }
   0xd   : > { %s3107_s23 = smov 16   ;;  %v5220_v61 = vmov 0  ;;  %s3108_s24 = smov 24  }
   0xe   : > { %s5622_s18 = smov (!%p189_p3, %s2859_s18), 1  ;;  %v3265_v27 = vshrl.u32 %v199_v24, 7  ;;  %s3109_s25 = smov 32  }
   0xf   : > { %s3028_s3 = smul.u32 296, %s5622_s18  ;;  %s3110_s26 = smov 40  }
  0x10   : > { %v201_v30 = vadd.s32 8, %v3265_v27  ;;  %v203_v34 = vadd.s32 24, %v3265_v27  ;;  %v205_v40 = vadd.s32 40, %v3265_v27  ;;  %v207_v46 = vadd.s32 56, %v3265_v27  ;;  %s3111_s5 = smov 48   ;;  %s3112_s12 = smov 56  }
  0x11   : > { %s3156_s21 = scalar_lea.vmem %s5072_s0, %s3028_s3  ;;  %v209_v52 = vadd.s32 72, %v3265_v27  ;;  %v211_v58 = vadd.s32 88, %v3265_v27  ;;  %s3113_s20 = smov 64  }
  0x12   : > { %v3159_v0 = vld [vmem:[%s3156_s21 + $0x11] sm:$0xff]  ;;  %v808_v1 = vld [vmem:[%s3156_s21 + $0x1] sm:$0xff]  ;;  %v3166_v2 = vld [vmem:[%s3156_s21 + $0x19] sm:$0xff]  ;;  %v243_v33 = vand.u32 15, %v201_v30  ;;  %v257_v39 = vand.u32 15, %v203_v34  ;;  %v271_v45 = vand.u32 15, %v205_v40 }
  0x13   : > { %1144 = vrot.lane.b32.xlu1 %v3159_v0, %s3106_s22  ;;  %1140 = vrot.lane.b32.xlu0 %v808_v1, %s3106_s22  ;;  %v809_v3 = vld [vmem:[%s3156_s21 + $0x9] sm:$0xff]  ;;  %v3176_v5 = vld [vmem:[%s3156_s21 + $0x21] sm:$0xff]  ;;  %v285_v51 = vand.u32 15, %v207_v46  ;;  %v299_v57 = vand.u32 15, %v209_v52  ;;  %v313_v63 = vand.u32 15, %v211_v58  ;;  %v213_v1 = vadd.s32 104, %v3265_v27 }
  0x14   : > { %v3173_v4 = vld [vmem:[%s3156_s21 + $0x29] sm:$0xff]  ;;  %v3183_v6 = vld [vmem:[%s3156_s21 + $0x39] sm:$0xff]  ;;  %v3186_v7 = vld [vmem:[%s3156_s21 + $0x31] sm:$0xff]  ;;  %vm3281_vm0 = vcmp.ne.s32.totalorder %v243_v33, 15  ;;  %vm3292_vm1 = vcmp.ne.s32.totalorder %v257_v39, 15  ;;  %vm3308_vm2 = vcmp.ne.s32.totalorder %v271_v45, 15 }
  0x15   : > { %v3193_v8 = vld [vmem:[%s3156_s21 + $0x49] sm:$0xff]  ;;  %v3196_v9 = vld [vmem:[%s3156_s21 + $0x41] sm:$0xff]  ;;  %v3203_v10 = vld [vmem:[%s3156_s21 + $0x59] sm:$0xff]  ;;  %v5210_v43 = vsel %vm3292_vm1, 4294967295, %v5209_v43  ;;  %v5213_v49 = vsel %vm3308_vm2, 4294967295, %v5212_v49  ;;  %vm3325_vm3 = vcmp.ne.s32.totalorder %v285_v51, 15 }
  0x16   : > { %v3206_v11 = vld [vmem:[%s3156_s21 + $0x51] sm:$0xff]  ;;  %v3213_v12 = vld [vmem:[%s3156_s21 + $0x69] sm:$0xff]  ;;  %v3216_v13 = vld [vmem:[%s3156_s21 + $0x61] sm:$0xff]  ;;  %5211 = vst [vmem:[#allocation4_spill] sm:$0xff] %v5210_v43  ;;  %v5216_v55 = vsel %vm3325_vm3, 4294967295, %v5215_v55  ;;  %vm3342_vm4 = vcmp.ne.s32.totalorder %v299_v57, 15 }
  0x17   : > { %1146 = vrot.lane.b32.xlu1 %v3166_v2, %s3106_s22  ;;  %1142 = vrot.lane.b32.xlu0 %v809_v3, %s3106_s22  ;;  %v3223_v14 = vld [vmem:[%s3156_s21 + $0x79] sm:$0xff]  ;;  %v3226_v15 = vld [vmem:[%s3156_s21 + $0x71] sm:$0xff]  ;;  %5214 = vst [vmem:[#allocation5_spill] sm:$0xff] %v5213_v49  ;;  %5217 = vst [vmem:[#allocation6_spill] sm:$0xff] %v5216_v55  ;;  %v5221_v61 = vsel %vm3342_vm4, 4294967295, %v5220_v61  ;;  %vm3354_vm5 = vcmp.ne.s32.totalorder %v313_v63, 15 }
  0x18   : > { %v825_v16 = vld [vmem:[%s3156_s21 + $0x89] sm:$0xff]  ;;  %v824_v17 = vld [vmem:[%s3156_s21 + $0x81] sm:$0xff]  ;;  %v3237_v18 = vld [vmem:[%s3156_s21 + $0x99] sm:$0xff]  ;;  %5222 = vst [vmem:[#allocation9_spill] sm:$0xff] %v5221_v61  ;;  %v327_v24 = vand.u32 15, %v213_v1  ;;  %v219_v39 = vadd.s32 152, %v3265_v27 }
  0x19   : > { %v3240_v19 = vld [vmem:[%s3156_s21 + $0x91] sm:$0xff]  ;;  %v3247_v20 = vld [vmem:[%s3156_s21 + $0xa9] sm:$0xff]  ;;  %v3250_v21 = vld [vmem:[%s3156_s21 + $0xa1] sm:$0xff]  ;;  %v5237_v1 = vmov 0 }
  0x1a   : > { %v831_v22 = vld [vmem:[%s3156_s21 + $0xb9] sm:$0xff]  ;;  %v3258_v23 = vld [vmem:[%s3156_s21 + $0xb1] sm:$0xff]  ;;  %v833_v25 = vld [vmem:[%s3156_s21 + $0xc9] sm:$0xff]  ;;  %vm3365_vm6 = vcmp.ne.s32.totalorder %v327_v24, 15  ;;  %v369_v46 = vand.u32 15, %v219_v39  ;;  %v229_v39 = vadd.s32 232, %v3265_v27 }
  0x1b   : > { %1150 = vrot.lane.b32.xlu1 %v3173_v4, %s3106_s22  ;;  %1148 = vrot.lane.b32.xlu0 %v3176_v5, %s3106_s22  ;;  %5206 = vst [vmem:[#allocation3_spill] sm:$0xff] %v3258_v23  ;;  %v832_v26 = vld [vmem:[%s3156_s21 + $0xc1] sm:$0xff]  ;;  %v835_v28 = vld [vmem:[%s3156_s21 + $0xd9] sm:$0xff] }
  0x1c   : > { %v834_v29 = vld [vmem:[%s3156_s21 + $0xd1] sm:$0xff]  ;;  %v837_v31 = vld [vmem:[%s3156_s21 + $0xe9] sm:$0xff]  ;;  %v836_v32 = vld [vmem:[%s3156_s21 + $0xe1] sm:$0xff]  ;;  %vm3398_vm9 = vcmp.ne.s32.totalorder %v369_v46, 15 }
  0x1d   : > { %v839_v35 = vld [vmem:[%s3156_s21 + $0xf9] sm:$0xff]  ;;  %v838_v36 = vld [vmem:[%s3156_s21 + $0xf1] sm:$0xff]  ;;  %v840_v42 = vld [vmem:[%s3156_s21 + $0x2] sm:$0xff] }
  0x1e   : > { %v841_v38 = vld [vmem:[%s3156_s21 + $0xa] sm:$0xff]  ;;  %v3297_v44 = vld [vmem:[%s3156_s21 + $0x1a] sm:$0xff]  ;;  %v3306_v48 = vld [vmem:[%s3156_s21 + $0x12] sm:$0xff] }
  0x1f   : > { %1154 = vrot.lane.b32.xlu1 %v3183_v6, %s3106_s22  ;;  %1152 = vrot.lane.b32.xlu0 %v3186_v7, %s3106_s22  ;;  %v937_v41 = vsel %vm3281_vm0, %v841_v38, 0.0  ;;  %v939_v47 = vsel %vm3292_vm1, %v3297_v44, 0.0  ;;  %v3313_v50 = vld [vmem:[%s3156_s21 + $0x2a] sm:$0xff]  ;;  %v3323_v54 = vld [vmem:[%s3156_s21 + $0x22] sm:$0xff] }
  0x20   : > { %v941_v53 = vsel %vm3308_vm2, %v3313_v50, 0.0  ;;  %v3330_v56 = vld [vmem:[%s3156_s21 + $0x3a] sm:$0xff]  ;;  %v3340_v60 = vld [vmem:[%s3156_s21 + $0x32] sm:$0xff]  ;;  %v849_v62 = vld [vmem:[%s3156_s21 + $0x4a] sm:$0xff] }
  0x21   : > { %5218 = vst [vmem:[#allocation7_spill] sm:$0xff] %v3330_v56  ;;  %v943_v59 = vsel %vm3325_vm3, %v3330_v56, 0.0  ;;  %5219 = vst [vmem:[#allocation8_spill] sm:$0xff] %v3340_v60  ;;  %v945_v3 = vsel %vm3342_vm4, %v849_v62, 0.0  ;;  %v853_v30 = vld [vmem:[%s3156_s21 + $0x6a] sm:$0xff]  ;;  %v852_v34 = vld [vmem:[%s3156_s21 + $0x62] sm:$0xff] }
  0x22   : > { %v949_v33 = vsel %vm3365_vm6, %v853_v30, 0.0  ;;  %v857_v45 = vld [vmem:[%s3156_s21 + $0x8a] sm:$0xff]  ;;  %v856_v52 = vld [vmem:[%s3156_s21 + $0x82] sm:$0xff]  ;;  %v3403_v57 = vld [vmem:[%s3156_s21 + $0x9a] sm:$0xff] }
  0x23   : > { %1158 = vrot.lane.b32.xlu1 %v3193_v8, %s3106_s22  ;;  %1156 = vrot.lane.b32.xlu0 %v3196_v9, %s3106_s22  ;;  %v955_v62 = vsel %vm3398_vm9, %v3403_v57, 0.0  ;;  %v3412_v63 = vld [vmem:[%s3156_s21 + $0x92] sm:$0xff]  ;;  %v867_v46 = vld [vmem:[%s3156_s21 + $0xda] sm:$0xff] }
  0x24   : > { %v3593_v49 = vld [vmem:[%s3156_s21 + $0x50] sm:$0xff]  ;;  %v3656_v43 = vld [vmem:[%s3156_s21 + $0x80] sm:$0xff] }
  0x25   : > { %5297 = vst [vmem:[#allocation46_spill] sm:$0xff] %v3656_v43 }
  0x27   : > { %1162 = vrot.lane.b32.xlu1 %v3203_v10, %s3106_s22  ;;  %1160 = vrot.lane.b32.xlu0 %v3206_v11, %s3106_s22 }
  0x2b   : > { %1166 = vrot.lane.b32.xlu1 %v3213_v12, %s3106_s22  ;;  %1164 = vrot.lane.b32.xlu0 %v3216_v13, %s3106_s22 }
  0x2f   : > { %1170 = vrot.lane.b32.xlu1 %v3223_v14, %s3106_s22  ;;  %1168 = vrot.lane.b32.xlu0 %v3226_v15, %s3106_s22 }
  0x33   : > { %1174 = vrot.lane.b32.xlu1 %v825_v16, %s3106_s22  ;;  %1172 = vrot.lane.b32.xlu0 %v824_v17, %s3106_s22  ;;  %v848_v16 = vld [vmem:[%s3156_s21 + $0x42] sm:$0xff]  ;;  %v5223_v17 = vmov 0 }
  0x34   : > { %v5224_v17 = vsel %vm3354_vm5, 4294967295, %v5223_v17 }
  0x35   : > { %5225 = vst [vmem:[#allocation10_spill] sm:$0xff] %v5224_v17  ;;  %v3531_v17 = vld [vmem:[%s3156_s21 + $0x20] sm:$0xff] }
  0x37   : > { %1178 = vrot.lane.b32.xlu1 %v3237_v18, %s3106_s22  ;;  %1176 = vrot.lane.b32.xlu0 %v3240_v19, %s3106_s22 }
  0x3b   : > { %1182 = vrot.lane.b32.xlu1 %v3247_v20, %s3106_s22  ;;  %1180 = vrot.lane.b32.xlu0 %v3250_v21, %s3106_s22 }
  0x3f   : > { %1186 = vrot.lane.b32.xlu1 %v831_v22, %s3106_s22  ;;  %1184 = vrot.lane.b32.xlu0 %v3258_v23, %s3106_s22  ;;  %v851_v22 = vld [vmem:[%s3156_s21 + $0x5a] sm:$0xff] }
  0x43   : > { %1190 = vrot.lane.b32.xlu1 %v833_v25, %s3106_s22  ;;  %1188 = vrot.lane.b32.xlu0 %v832_v26, %s3106_s22  ;;  %v215_v25 = vadd.s32 120, %v3265_v27  ;;  %v947_v26 = vsel %vm3354_vm5, %v851_v22, 0.0  ;;  %v225_v22 = vadd.s32 200, %v3265_v27 }
  0x45   : > { %v411_v30 = vand.u32 15, %v225_v22  ;;  %v869_v22 = vld [vmem:[%s3156_s21 + $0xea] sm:$0xff] }
  0x47   : > { %1194 = vrot.lane.b32.xlu1 %v835_v28, %s3106_s22  ;;  %1192 = vrot.lane.b32.xlu0 %v834_v29, %s3106_s22  ;;  %v850_v28 = vld [vmem:[%s3156_s21 + $0x52] sm:$0xff]  ;;  %v5226_v29 = vmov 0  ;;  %vm3448_vm12 = vcmp.ne.s32.totalorder %v411_v30, 15 }
  0x48   : > { %v5227_v29 = vsel %vm3365_vm6, 4294967295, %v5226_v29 }
  0x49   : > { %5228 = vst [vmem:[#allocation11_spill] sm:$0xff] %v5227_v29  ;;  %v5263_v29 = vmov 0 }
  0x4b   : > { %1198 = vrot.lane.b32.xlu1 %v837_v31, %s3106_s22  ;;  %1196 = vrot.lane.b32.xlu0 %v836_v32, %s3106_s22  ;;  %v341_v31 = vand.u32 15, %v215_v25  ;;  %v217_v32 = vadd.s32 136, %v3265_v27  ;;  %v3429_v25 = vld [vmem:[%s3156_s21 + $0xa2] sm:$0xff] }
  0x4d   : > { %vm3376_vm7 = vcmp.ne.s32.totalorder %v341_v31, 15  ;;  %v355_v38 = vand.u32 15, %v217_v32  ;;  %v227_v31 = vadd.s32 216, %v3265_v27 }
  0x4f   : > { %1202 = vrot.lane.b32.xlu1 %v839_v35, %s3106_s22  ;;  %1200 = vrot.lane.b32.xlu0 %v838_v36, %s3106_s22  ;;  %v5229_v35 = vmov 0  ;;  %v855_v36 = vld [vmem:[%s3156_s21 + $0x7a] sm:$0xff]  ;;  %vm3387_vm8 = vcmp.ne.s32.totalorder %v355_v38, 15  ;;  %v425_v38 = vand.u32 15, %v227_v31  ;;  %v868_v31 = vld [vmem:[%s3156_s21 + $0xe2] sm:$0xff] }
  0x50   : > { %v5230_v35 = vsel %vm3376_vm7, 4294967295, %v5229_v35  ;;  %v951_v40 = vsel %vm3376_vm7, %v855_v36, 0.0  ;;  %v953_v51 = vsel %vm3387_vm8, %v857_v45, 0.0  ;;  %v3453_v36 = vld [vmem:[%s3156_s21 + $0xca] sm:$0xff]  ;;  %v5250_v45 = vmov 0 }
  0x51   : > { %5231 = vst [vmem:[#allocation12_spill] sm:$0xff] %v5230_v35  ;;  %5248 = vst [vmem:[#allocation19_spill] sm:$0xff] %v3453_v36  ;;  %vm3465_vm13 = vcmp.ne.s32.totalorder %v425_v38, 15  ;;  %v682_v35 = vld [vmem:[%s3156_s21 + $0x10] sm:$0xff] }
  0x52   : > { %v5251_v45 = vsel %vm3465_vm13, 4294967295, %v5250_v45 }
  0x53   : > { %1270 = vrot.lane.b32.xlu1 %v937_v41, %s3107_s23  ;;  %1268 = vrot.lane.b32.xlu0 %v840_v42, %s3107_s23  ;;  %v854_v41 = vld [vmem:[%s3156_s21 + $0x72] sm:$0xff]  ;;  %5252 = vst [vmem:[#allocation21_spill] sm:$0xff] %v5251_v45  ;;  %v5269_v45 = vmov 0 }
  0x57   : > { %1274 = vrot.lane.b32.xlu1 %v939_v47, %s3107_s23  ;;  %1272 = vrot.lane.b32.xlu0 %v3306_v48, %s3107_s23  ;;  %v221_v47 = vadd.s32 168, %v3265_v27 }
  0x59   : > { %v383_v58 = vand.u32 15, %v221_v47  ;;  %v439_v47 = vand.u32 15, %v229_v39  ;;  %v5260_v39 = vmov 0 }
  0x5b   : > { %1278 = vrot.lane.b32.xlu1 %v941_v53, %s3107_s23  ;;  %1276 = vrot.lane.b32.xlu0 %v3323_v54, %s3107_s23  ;;  %v5234_v53 = vmov 0  ;;  %vm3414_vm10 = vcmp.ne.s32.totalorder %v383_v58, 15  ;;  %v866_v58 = vld [vmem:[%s3156_s21 + $0xd2] sm:$0xff]  ;;  %vm3481_vm14 = vcmp.ne.s32.totalorder %v439_v47, 15  ;;  %v236_v47 = vand.u32 15, %v3265_v27 }
  0x5c   : > { %v5235_v53 = vsel %vm3398_vm9, 4294967295, %v5234_v53  ;;  %v5238_v1 = vsel %vm3414_vm10, 4294967295, %v5237_v1  ;;  %v965_v30 = vsel %vm3481_vm14, %v869_v22, 0.0 }
  0x5d   : > { %5236 = vst [vmem:[#allocation13_spill] sm:$0xff] %v5235_v53  ;;  %5239 = vst [vmem:[#allocation14_spill] sm:$0xff] %v5238_v1  ;;  %vm3512_vm7 = vcmp.ne.s32.totalorder %v236_v47, 0  ;;  %v5266_v47 = vmov 0  ;;  %v3716_v53 = vld [vmem:[%s3156_s21 + $0xb0] sm:$0xff] }
  0x5e   : > { %v5264_v29 = vsel %vm3512_vm7, 4294967295, %v5263_v29  ;;  %5315 = vst [vmem:[#allocation58_spill] sm:$0xff] %v3716_v53 }
  0x5f   : > { %1282 = vrot.lane.b32.xlu1 %v943_v59, %s3107_s23  ;;  %1280 = vrot.lane.b32.xlu0 %v3340_v60, %s3107_s23  ;;  %v223_v59 = vadd.s32 184, %v3265_v27  ;;  %5265 = vst [vmem:[#allocation28_spill] sm:$0xff] %v5264_v29  ;;  %v3614_v60 = vld [vmem:[%s3156_s21 + $0x60] sm:$0xff] }
  0x60   : > { %5283 = vst [vmem:[#allocation36_spill] sm:$0xff] %v3614_v60 }
  0x63   : > { %1286 = vrot.lane.b32.xlu1 %v945_v3, %s3107_s23  ;;  %1284 = vrot.lane.b32.xlu0 %v848_v16, %s3107_s23  ;;  %v3419_v3 = vld [vmem:[%s3156_s21 + $0xaa] sm:$0xff]  ;;  %v397_v16 = vand.u32 15, %v223_v59 }
  0x64   : > { %v957_v24 = vsel %vm3414_vm10, %v3419_v3, 0.0 }
  0x65   : > { %vm3431_vm11 = vcmp.ne.s32.totalorder %v397_v16, 15  ;;  %v5255_v16 = vmov 0 }
  0x66   : > { %v5256_v16 = vsel %vm3481_vm14, 4294967295, %v5255_v16 }
  0x67   : > { %1290 = vrot.lane.b32.xlu1 %v947_v26, %s3107_s23  ;;  %1288 = vrot.lane.b32.xlu0 %v850_v28, %s3107_s23  ;;  %v5240_v26 = vmov 0  ;;  %v3436_v28 = vld [vmem:[%s3156_s21 + $0xba] sm:$0xff]  ;;  %5257 = vst [vmem:[#allocation24_spill] sm:$0xff] %v5256_v16  ;;  %v204_v16 = vadd.s32 32, %v3265_v27 }
  0x68   : > { %v5241_v26 = vsel %vm3431_vm11, 4294967295, %v5240_v26  ;;  %5243 = vst [vmem:[#allocation16_spill] sm:$0xff] %v3436_v28  ;;  %v959_v32 = vsel %vm3431_vm11, %v3436_v28, 0.0  ;;  %v5281_v28 = vmov 0 }
  0x69   : > { %5242 = vst [vmem:[#allocation15_spill] sm:$0xff] %v5241_v26 }
  0x6b   : > { %1294 = vrot.lane.b32.xlu1 %v949_v33, %s3107_s23  ;;  %1292 = vrot.lane.b32.xlu0 %v852_v34, %s3107_s23  ;;  %v3446_v33 = vld [vmem:[%s3156_s21 + $0xb2] sm:$0xff]  ;;  %v5245_v34 = vmov 0 }
  0x6c   : > { %5244 = vst [vmem:[#allocation17_spill] sm:$0xff] %v3446_v33  ;;  %v5246_v34 = vsel %vm3448_vm12, 4294967295, %v5245_v34 }
  0x6d   : > { %5247 = vst [vmem:[#allocation18_spill] sm:$0xff] %v5246_v34 }
  0x6f   : > { %1298 = vrot.lane.b32.xlu1 %v951_v40, %s3107_s23  ;;  %1296 = vrot.lane.b32.xlu0 %v854_v41, %s3107_s23  ;;  %v961_v40 = vsel %vm3448_vm12, %v3453_v36, 0.0  ;;  %v3463_v41 = vld [vmem:[%s3156_s21 + $0xc2] sm:$0xff] }
  0x70   : > { %5249 = vst [vmem:[#allocation20_spill] sm:$0xff] %v3463_v41 }
  0x73   : > { %1302 = vrot.lane.b32.xlu1 %v953_v51, %s3107_s23  ;;  %1300 = vrot.lane.b32.xlu0 %v856_v52, %s3107_s23  ;;  %v231_v51 = vadd.s32 248, %v3265_v27  ;;  %v963_v52 = vsel %vm3465_vm13, %v867_v46, 0.0  ;;  %v202_v46 = vadd.s32 16, %v3265_v27 }
  0x77   : > { %1306 = vrot.lane.b32.xlu1 %v955_v62, %s3107_s23  ;;  %1304 = vrot.lane.b32.xlu0 %v3412_v63, %s3107_s23 }
  0x7b   : > { %1310 = vrot.lane.b32.xlu1 %v957_v24, %s3107_s23  ;;  %1308 = vrot.lane.b32.xlu0 %v3429_v25, %s3107_s23  ;;  %v453_v24 = vand.u32 15, %v231_v51 }
  0x7d   : > { %vm3495_vm15 = vcmp.ne.s32.totalorder %v453_v24, 15  ;;  %v250_v24 = vand.u32 15, %v202_v46  ;;  %v683_v46 = vld [vmem:[%s3156_s21 + $0x18] sm:$0xff] }
  0x7e   : > { %v5261_v39 = vsel %vm3495_vm15, 4294967295, %v5260_v39 }
  0x7f   : > { %1314 = vrot.lane.b32.xlu1 %v959_v32, %s3107_s23  ;;  %1312 = vrot.lane.b32.xlu0 %v3446_v33, %s3107_s23  ;;  %5262 = vst [vmem:[#allocation27_spill] sm:$0xff] %v5261_v39  ;;  %v264_v39 = vand.u32 15, %v204_v16  ;;  %v3544_v16 = vld [vmem:[%s3156_s21 + $0x28] sm:$0xff] }
  0x81   : > { %vm3546_vm6 = vcmp.ne.s32.totalorder %v264_v39, 0 }
  0x82   : > { %v5270_v45 = vsel %vm3546_vm6, 4294967295, %v5269_v45 }
  0x83   : > { %1318 = vrot.lane.b32.xlu1 %v961_v40, %s3107_s23  ;;  %1316 = vrot.lane.b32.xlu0 %v3463_v41, %s3107_s23  ;;  %v871_v40 = vld [vmem:[%s3156_s21 + $0xfa] sm:$0xff] }
  0x84   : > { %v967_v51 = vsel %vm3495_vm15, %v871_v40, 0.0  ;;  %vm3526_vm15 = vcmp.ne.s32.totalorder %v250_v24, 0 }
  0x85   : > { %v3477_v59 = vpop.permute.xlu1 %1144  ;;  %v3479_v62 = vpop.permute.xlu0 %1140  ;;  %v5267_v47 = vsel %vm3526_vm15, 4294967295, %v5266_v47 }
  0x86   : > { %5253 = vst [vmem:[#allocation22_spill] sm:$0xff] %v3477_v59  ;;  %5254 = vst [vmem:[#allocation23_spill] sm:$0xff] %v3479_v62  ;;  %v3551_v59 = vld [vmem:[%s3156_s21 + $0x30] sm:$0xff]  ;;  %v3572_v62 = vld [vmem:[%s3156_s21 + $0x40] sm:$0xff] }
  0x87   : > { %1322 = vrot.lane.b32.xlu1 %v963_v52, %s3107_s23  ;;  %1320 = vrot.lane.b32.xlu0 %v866_v58, %s3107_s23  ;;  %v870_v52 = vld [vmem:[%s3156_s21 + $0xf2] sm:$0xff]  ;;  %5268 = vst [vmem:[#allocation29_spill] sm:$0xff] %v5267_v47 }
  0x89   : > { %v3491_v32 = vpop.permute.xlu1 %1146  ;;  %v3493_v38 = vpop.permute.xlu0 %1142 }
  0x8a   : > { %5258 = vst [vmem:[#allocation25_spill] sm:$0xff] %v3491_v32  ;;  %5259 = vst [vmem:[#allocation26_spill] sm:$0xff] %v3493_v38 }
  0x8b   : > { %1326 = vrot.lane.b32.xlu1 %v965_v30, %s3107_s23  ;;  %1324 = vrot.lane.b32.xlu0 %v868_v31, %s3107_s23  ;;  %v970_v30 = vsel %vm3512_vm7, %v682_v35, 0.0  ;;  %v972_v35 = vsel %vm3526_vm15, %v3531_v17, 0.0 }
  0x8d   : > { %v3507_v58 = vpop.permute.xlu1 %1150  ;;  %v3509_v22 = vpop.permute.xlu0 %1148 }
  0x8f   : > { %1330 = vrot.lane.b32.xlu1 %v967_v51, %s3107_s23  ;;  %1328 = vrot.lane.b32.xlu0 %v870_v52, %s3107_s23  ;;  %v206_v51 = vadd.s32 48, %v3265_v27 }
  0x91   : > { %v3521_v31 = vpop.permute.xlu1 %1154  ;;  %v3523_v40 = vpop.permute.xlu0 %1152  ;;  %v278_v32 = vand.u32 15, %v206_v51  ;;  %v3565_v51 = vld [vmem:[%s3156_s21 + $0x38] sm:$0xff] }
  0x93   : > { %1398 = vrot.lane.b32.xlu1 %v683_v46, %s3108_s24  ;;  %1396 = vrot.lane.b32.xlu0 %v970_v30, %s3108_s24  ;;  %v208_v30 = vadd.s32 64, %v3265_v27  ;;  %v974_v46 = vsel %vm3546_vm6, %v3551_v59, 0.0  ;;  %vm3567_vm14 = vcmp.ne.s32.totalorder %v278_v32, 0 }
  0x94   : > { %v976_v55 = vsel %vm3567_vm14, %v3572_v62, 0.0 }
  0x95   : > { %v3539_v52 = vpop.permute.xlu1 %1158  ;;  %v3541_v24 = vpop.permute.xlu0 %1156  ;;  %v292_v38 = vand.u32 15, %v208_v30  ;;  %v3586_v30 = vld [vmem:[%s3156_s21 + $0x48] sm:$0xff] }
  0x97   : > { %1402 = vrot.lane.b32.xlu1 %v3544_v16, %s3108_s24  ;;  %1400 = vrot.lane.b32.xlu0 %v972_v35, %s3108_s24  ;;  %v210_v35 = vadd.s32 80, %v3265_v27  ;;  %vm3588_vm5 = vcmp.ne.s32.totalorder %v292_v38, 0 }
  0x98   : > { %v978_v1 = vsel %vm3588_vm5, %v3593_v49, 0.0 }
  0x99   : > { %v3560_v39 = vpop.permute.xlu1 %1162  ;;  %v3562_v61 = vpop.permute.xlu0 %1160  ;;  %v306_v41 = vand.u32 15, %v210_v35  ;;  %v3607_v35 = vld [vmem:[%s3156_s21 + $0x58] sm:$0xff] }
  0x9a   : > { %5271 = vst [vmem:[#allocation30_spill] sm:$0xff] %v3562_v61  ;;  %5280 = vst [vmem:[#allocation35_spill] sm:$0xff] %v3607_v35  ;;  %v3737_v61 = vld [vmem:[%s3156_s21 + $0xc0] sm:$0xff] }
  0x9b   : > { %1406 = vrot.lane.b32.xlu1 %v3565_v51, %s3108_s24  ;;  %1404 = vrot.lane.b32.xlu0 %v974_v46, %s3108_s24  ;;  %v212_v46 = vadd.s32 96, %v3265_v27  ;;  %vm3609_vm13 = vcmp.ne.s32.totalorder %v306_v41, 0  ;;  %5322 = vst [vmem:[#allocation63_spill] sm:$0xff] %v3737_v61 }
  0x9c   : > { %v5282_v28 = vsel %vm3609_vm13, 4294967295, %v5281_v28  ;;  %v980_v23 = vsel %vm3609_vm13, %v3614_v60, 0.0 }
  0x9d   : > { %v3581_v32 = vpop.permute.xlu1 %1166  ;;  %v3583_v26 = vpop.permute.xlu0 %1164  ;;  %v320_v33 = vand.u32 15, %v212_v46  ;;  %v3628_v46 = vld [vmem:[%s3156_s21 + $0x68] sm:$0xff] }
  0x9e   : > { %5274 = vst [vmem:[#allocation31_spill] sm:$0xff] %v3581_v32  ;;  %5275 = vst [vmem:[#allocation32_spill] sm:$0xff] %v3583_v26  ;;  %v3635_v26 = vld [vmem:[%s3156_s21 + $0x70] sm:$0xff]  ;;  %v5294_v32 = vmov 0 }
  0x9f   : > { %1410 = vrot.lane.b32.xlu1 %v3586_v30, %s3108_s24  ;;  %1408 = vrot.lane.b32.xlu0 %v976_v55, %s3108_s24  ;;  %v214_v55 = vadd.s32 112, %v3265_v27  ;;  %5286 = vst [vmem:[#allocation39_spill] sm:$0xff] %v3628_v46  ;;  %vm3630_vm4 = vcmp.ne.s32.totalorder %v320_v33, 0  ;;  %5290 = vst [vmem:[#allocation41_spill] sm:$0xff] %v3635_v26 }
  0xa1   : > { %v3602_v38 = vpop.permute.xlu1 %1170  ;;  %v3604_v56 = vpop.permute.xlu0 %1168  ;;  %v334_v47 = vand.u32 15, %v214_v55  ;;  %v3649_v55 = vld [vmem:[%s3156_s21 + $0x78] sm:$0xff]  ;;  %v5356_v37 = vld [vmem:[#allocation35_spill] sm:$0xff] }
  0xa2   : > { %5278 = vst [vmem:[#allocation33_spill] sm:$0xff] %v3602_v38  ;;  %5279 = vst [vmem:[#allocation34_spill] sm:$0xff] %v3604_v56  ;;  %v5287_v38 = vmov 0 }
  0xa3   : > { %1414 = vrot.lane.b32.xlu1 %v3607_v35, %s3108_s24  ;;  %1412 = vrot.lane.b32.xlu0 %v978_v1, %s3108_s24  ;;  %v5288_v38 = vsel %vm3630_vm4, 4294967295, %v5287_v38  ;;  %v216_v1 = vadd.s32 128, %v3265_v27  ;;  %5293 = vst [vmem:[#allocation44_spill] sm:$0xff] %v3649_v55  ;;  %vm3651_vm12 = vcmp.ne.s32.totalorder %v334_v47, 0  ;;  %v3758_v35 = vld [vmem:[%s3156_s21 + $0xd0] sm:$0xff] }
  0xa4   : > { %5289 = vst [vmem:[#allocation40_spill] sm:$0xff] %v5288_v38  ;;  %v5295_v32 = vsel %vm3651_vm12, 4294967295, %v5294_v32  ;;  %v3677_v38 = vld [vmem:[%s3156_s21 + $0x90] sm:$0xff]  ;;  %5328 = vst [vmem:[#allocation67_spill] sm:$0xff] %v3758_v35 }
  0xa5   : > { %v3623_v41 = vpop.permute.xlu1 %1174  ;;  %v3625_v56 = vpop.permute.xlu0 %1172  ;;  %5296 = vst [vmem:[#allocation45_spill] sm:$0xff] %v5295_v32  ;;  %v348_v60 = vand.u32 15, %v216_v1  ;;  %v3670_v1 = vld [vmem:[%s3156_s21 + $0x88] sm:$0xff]  ;;  %5304 = vst [vmem:[#allocation51_spill] sm:$0xff] %v3677_v38  ;;  %v3696_v32 = vld [vmem:[%s3156_s21 + $0xa0] sm:$0xff] }
  0xa6   : > { %5284 = vst [vmem:[#allocation37_spill] sm:$0xff] %v3623_v41  ;;  %5285 = vst [vmem:[#allocation38_spill] sm:$0xff] %v3625_v56  ;;  %v982_v41 = vsel %vm3630_vm4, %v3635_v26, 0.0  ;;  %v5301_v26 = vmov 0 }
  0xa7   : > { %1418 = vrot.lane.b32.xlu1 %v3628_v46, %s3108_s24  ;;  %1416 = vrot.lane.b32.xlu0 %v980_v23, %s3108_s24  ;;  %v218_v23 = vadd.s32 144, %v3265_v27  ;;  %5300 = vst [vmem:[#allocation49_spill] sm:$0xff] %v3670_v1  ;;  %vm3672_vm3 = vcmp.ne.s32.totalorder %v348_v60, 0 }
  0xa8   : > { %v5302_v26 = vsel %vm3672_vm3, 4294967295, %v5301_v26 }
  0xa9   : > { %v3644_v33 = vpop.permute.xlu1 %1178  ;;  %v3646_v56 = vpop.permute.xlu0 %1176  ;;  %5303 = vst [vmem:[#allocation50_spill] sm:$0xff] %v5302_v26  ;;  %v362_v46 = vand.u32 15, %v218_v23  ;;  %v699_v23 = vld [vmem:[%s3156_s21 + $0x98] sm:$0xff] }
  0xaa   : > { %5291 = vst [vmem:[#allocation42_spill] sm:$0xff] %v3644_v33  ;;  %5292 = vst [vmem:[#allocation43_spill] sm:$0xff] %v3646_v56  ;;  %v984_v33 = vsel %vm3651_vm12, %v3656_v43, 0.0  ;;  %v986_v43 = vsel %vm3672_vm3, %v3677_v38, 0.0 }
  0xab   : > { %1422 = vrot.lane.b32.xlu1 %v3649_v55, %s3108_s24  ;;  %1420 = vrot.lane.b32.xlu0 %v982_v41, %s3108_s24  ;;  %v220_v41 = vadd.s32 160, %v3265_v27  ;;  %vm3691_vm11 = vcmp.ne.s32.totalorder %v362_v46, 0 }
  0xad   : > { %v3665_v47 = vpop.permute.xlu1 %1182  ;;  %v3667_v56 = vpop.permute.xlu0 %1180  ;;  %v376_v55 = vand.u32 15, %v220_v41  ;;  %v5312_v41 = vmov 0 }
  0xae   : > { %5298 = vst [vmem:[#allocation47_spill] sm:$0xff] %v3665_v47  ;;  %5299 = vst [vmem:[#allocation48_spill] sm:$0xff] %v3667_v56  ;;  %v5307_v47 = vmov 0 }
  0xaf   : > { %1426 = vrot.lane.b32.xlu1 %v3670_v1, %s3108_s24  ;;  %1424 = vrot.lane.b32.xlu0 %v984_v33, %s3108_s24  ;;  %v5308_v47 = vsel %vm3691_vm11, 4294967295, %v5307_v47  ;;  %v222_v1 = vadd.s32 176, %v3265_v27  ;;  %v988_v33 = vsel %vm3691_vm11, %v3696_v32, 0.0  ;;  %vm3711_vm2 = vcmp.ne.s32.totalorder %v376_v55, 0 }
  0xb0   : > { %5309 = vst [vmem:[#allocation54_spill] sm:$0xff] %v5308_v47  ;;  %v5313_v41 = vsel %vm3711_vm2, 4294967295, %v5312_v41 }
  0xb1   : > { %v3686_v60 = vpop.permute.xlu1 %1186  ;;  %v3688_v56 = vpop.permute.xlu0 %1184  ;;  %5314 = vst [vmem:[#allocation57_spill] sm:$0xff] %v5313_v41  ;;  %v5326_v41 = vmov 0 }
  0xb2   : > { %5305 = vst [vmem:[#allocation52_spill] sm:$0xff] %v3686_v60  ;;  %5306 = vst [vmem:[#allocation53_spill] sm:$0xff] %v3688_v56  ;;  %v3709_v56 = vld [vmem:[%s3156_s21 + $0xa8] sm:$0xff]  ;;  %v390_v60 = vand.u32 15, %v222_v1  ;;  %v3730_v1 = vld [vmem:[%s3156_s21 + $0xb8] sm:$0xff] }
  0xb3   : > { %1430 = vrot.lane.b32.xlu1 %v699_v23, %s3108_s24  ;;  %1428 = vrot.lane.b32.xlu0 %v986_v43, %s3108_s24  ;;  %v224_v43 = vadd.s32 192, %v3265_v27  ;;  %v990_v23 = vsel %vm3711_vm2, %v3716_v53, 0.0  ;;  %5318 = vst [vmem:[#allocation61_spill] sm:$0xff] %v3730_v1 }
  0xb4   : > { %vm3732_vm10 = vcmp.ne.s32.totalorder %v390_v60, 0 }
  0xb5   : > { %v3704_v38 = vpop.permute.xlu1 %1190  ;;  %v3706_v46 = vpop.permute.xlu0 %1188  ;;  %v404_v47 = vand.u32 15, %v224_v43  ;;  %v3751_v43 = vld [vmem:[%s3156_s21 + $0xc8] sm:$0xff] }
  0xb6   : > { %5310 = vst [vmem:[#allocation55_spill] sm:$0xff] %v3704_v38  ;;  %5311 = vst [vmem:[#allocation56_spill] sm:$0xff] %v3706_v46  ;;  %v5319_v38 = vmov 0 }
  0xb7   : > { %1434 = vrot.lane.b32.xlu1 %v3709_v56, %s3108_s24  ;;  %1432 = vrot.lane.b32.xlu0 %v988_v33, %s3108_s24  ;;  %v5320_v38 = vsel %vm3732_vm10, 4294967295, %v5319_v38  ;;  %v226_v33 = vadd.s32 208, %v3265_v27  ;;  %5325 = vst [vmem:[#allocation66_spill] sm:$0xff] %v3751_v43  ;;  %vm3753_vm2 = vcmp.ne.s32.totalorder %v404_v47, 0 }
  0xb8   : > { %5321 = vst [vmem:[#allocation62_spill] sm:$0xff] %v5320_v38  ;;  %v5327_v41 = vsel %vm3753_vm2, 4294967295, %v5326_v41 }
  0xb9   : > { %v3725_v55 = vpop.permute.xlu1 %1194  ;;  %v3727_v46 = vpop.permute.xlu0 %1192  ;;  %v418_v53 = vand.u32 15, %v226_v33  ;;  %v3772_v33 = vld [vmem:[%s3156_s21 + $0xd8] sm:$0xff] }
  0xba   : > { %5316 = vst [vmem:[#allocation59_spill] sm:$0xff] %v3725_v55  ;;  %5317 = vst [vmem:[#allocation60_spill] sm:$0xff] %v3727_v46  ;;  %v992_v46 = vsel %vm3732_vm10, %v3737_v61, 0.0  ;;  %v5331_v61 = vmov 0 }
  0xbb   : > { %1438 = vrot.lane.b32.xlu1 %v3730_v1, %s3108_s24  ;;  %1436 = vrot.lane.b32.xlu0 %v990_v23, %s3108_s24  ;;  %v228_v23 = vadd.s32 224, %v3265_v27  ;;  %vm3774_vm10 = vcmp.ne.s32.totalorder %v418_v53, 0  ;;  %v3779_v1 = vld [vmem:[%s3156_s21 + $0xe0] sm:$0xff] }
  0xbc   : > { %v5332_v61 = vsel %vm3774_vm10, 4294967295, %v5331_v61  ;;  %5333 = vst [vmem:[#allocation70_spill] sm:$0xff] %v3779_v1 }
  0xbd   : > { %v3746_v60 = vpop.permute.xlu1 %1198  ;;  %v3748_v55 = vpop.permute.xlu0 %1196  ;;  %v432_v38 = vand.u32 15, %v228_v23  ;;  %v3793_v23 = vld [vmem:[%s3156_s21 + $0xe8] sm:$0xff] }
  0xbe   : > { %5323 = vst [vmem:[#allocation64_spill] sm:$0xff] %v3746_v60  ;;  %5324 = vst [vmem:[#allocation65_spill] sm:$0xff] %v3748_v55  ;;  %v994_v55 = vsel %vm3753_vm2, %v3758_v35, 0.0 }
  0xbf   : > { %1442 = vrot.lane.b32.xlu1 %v3751_v43, %s3108_s24  ;;  %1440 = vrot.lane.b32.xlu0 %v992_v46, %s3108_s24  ;;  %v230_v46 = vadd.s32 240, %v3265_v27  ;;  %5336 = vst [vmem:[#allocation73_spill] sm:$0xff] %v3793_v23  ;;  %vm3795_vm2 = vcmp.ne.s32.totalorder %v432_v38, 0  ;;  %v3800_v43 = vld [vmem:[%s3156_s21 + $0xf0] sm:$0xff]  ;;  %v968_v38 = vld [vmem:[%s3156_s21 + $0x100] sm:$0xff] }
  0xc0   : > { %5339 = vst [vmem:[#allocation74_spill] sm:$0xff] %v3800_v43 }
  0xc1   : > { %v3767_v47 = vpop.permute.xlu1 %1202  ;;  %v3769_v60 = vpop.permute.xlu0 %1200  ;;  %v446_v27 = vand.u32 15, %v230_v46  ;;  %v5343_v46 = vmov 0 }
  0xc2   : > { %5329 = vst [vmem:[#allocation68_spill] sm:$0xff] %v3767_v47  ;;  %5330 = vst [vmem:[#allocation69_spill] sm:$0xff] %v3769_v60  ;;  %v996_v60 = vsel %vm3774_vm10, %v3779_v1, 0.0  ;;  %v3814_v1 = vld [vmem:[%s3156_s21 + $0xf8] sm:$0xff] }
  0xc3   : > { %1446 = vrot.lane.b32.xlu1 %v3772_v33, %s3108_s24  ;;  %1444 = vrot.lane.b32.xlu0 %v994_v55, %s3108_s24  ;;  %v998_v55 = vsel %vm3795_vm2, %v3800_v43, 0.0  ;;  %5342 = vst [vmem:[#allocation77_spill] sm:$0xff] %v3814_v1  ;;  %vm3816_vm10 = vcmp.ne.s32.totalorder %v446_v27, 0 }
  0xc4   : > { %v5344_v46 = vsel %vm3816_vm10, 4294967295, %v5343_v46  ;;  %v1000_v43 = vsel %vm3816_vm10, %v968_v38, 0.0 }
  0xc5   : > { %v3788_v53 = vpop.permute.xlu1 %1270  ;;  %v3790_v47 = vpop.permute.xlu0 %1268  ;;  %5345 = vst [vmem:[#allocation78_spill] sm:$0xff] %v5344_v46 }
  0xc6   : > { %5334 = vst [vmem:[#allocation71_spill] sm:$0xff] %v3788_v53  ;;  %5335 = vst [vmem:[#allocation72_spill] sm:$0xff] %v3790_v47 }
  0xc7   : > { %1450 = vrot.lane.b32.xlu1 %v3793_v23, %s3108_s24  ;;  %1448 = vrot.lane.b32.xlu0 %v996_v60, %s3108_s24  ;;  %v969_v60 = vld [vmem:[%s3156_s21 + $0x108] sm:$0xff] }
  0xc9   : > { %v3808_v53 = vpop.permute.xlu1 %1274  ;;  %v3810_v47 = vpop.permute.xlu0 %1272 }
  0xca   : > { %5340 = vst [vmem:[#allocation75_spill] sm:$0xff] %v3808_v53  ;;  %5341 = vst [vmem:[#allocation76_spill] sm:$0xff] %v3810_v47 }
  0xcb   : > { %1454 = vrot.lane.b32.xlu1 %v3814_v1, %s3108_s24  ;;  %1452 = vrot.lane.b32.xlu0 %v998_v55, %s3108_s24 }
  0xcd   : > { %v3826_v23 = vpop.permute.xlu1 %1278  ;;  %v3828_v53 = vpop.permute.xlu0 %1276 }
  0xcf   : > { %1458 = vrot.lane.b32.xlu1 %v969_v60, %s3108_s24  ;;  %1456 = vrot.lane.b32.xlu0 %v1000_v43, %s3108_s24 }
  0xd1   : > { %v3832_v27 = vpop.permute.xlu1 %1282  ;;  %v3834_v47 = vpop.permute.xlu0 %1280 }
  0xd3   : > { %1496 = vrot.lane.b32.xlu1 %v3166_v2, %s3109_s25  ;;  %1494 = vrot.lane.b32.xlu0 %v3159_v0, %s3109_s25 }
  0xd5   : > { %v3840_v55 = vpop.permute.xlu1 %1286  ;;  %v3842_v38 = vpop.permute.xlu0 %1284 }
  0xd7   : > { %1500 = vrot.lane.b32.xlu1 %v3173_v4, %s3109_s25  ;;  %1498 = vrot.lane.b32.xlu0 %v3176_v5, %s3109_s25 }
  0xd9   : > { %v3848_v43 = vpop.permute.xlu1 %1290  ;;  %v3850_v60 = vpop.permute.xlu0 %1288 }
  0xdb   : > { %1504 = vrot.lane.b32.xlu1 %v3183_v6, %s3109_s25  ;;  %1502 = vrot.lane.b32.xlu0 %v3186_v7, %s3109_s25 }
  0xdd   : > { %v3856_v0 = vpop.permute.xlu1 %1294  ;;  %v3858_v2 = vpop.permute.xlu0 %1292 }
  0xdf   : > { %1508 = vrot.lane.b32.xlu1 %v3193_v8, %s3109_s25  ;;  %1506 = vrot.lane.b32.xlu0 %v3196_v9, %s3109_s25 }
  0xe1   : > { %v3864_v1 = vpop.permute.xlu1 %1298  ;;  %v3866_v46 = vpop.permute.xlu0 %1296 }
  0xe3   : > { %1512 = vrot.lane.b32.xlu1 %v3203_v10, %s3109_s25  ;;  %1510 = vrot.lane.b32.xlu0 %v3206_v11, %s3109_s25 }
  0xe5   : > { %v3872_v6 = vpop.permute.xlu1 %1302  ;;  %v3874_v7 = vpop.permute.xlu0 %1300 }
  0xe6   : > { %5346 = vst [vmem:[#allocation79_spill] sm:$0xff] %v3872_v6  ;;  %5347 = vst [vmem:[#allocation80_spill] sm:$0xff] %v3874_v7 }
  0xe7   : > { %1516 = vrot.lane.b32.xlu1 %v3213_v12, %s3109_s25  ;;  %1514 = vrot.lane.b32.xlu0 %v3216_v13, %s3109_s25 }
  0xe9   : > { %v3880_v8 = vpop.permute.xlu1 %1306  ;;  %v3882_v9 = vpop.permute.xlu0 %1304 }
  0xea   : > { %5348 = vst [vmem:[#allocation81_spill] sm:$0xff] %v3880_v8  ;;  %5349 = vst [vmem:[#allocation82_spill] sm:$0xff] %v3882_v9 }
  0xeb   : > { %1520 = vrot.lane.b32.xlu1 %v3223_v14, %s3109_s25  ;;  %1518 = vrot.lane.b32.xlu0 %v3226_v15, %s3109_s25  ;;  %v1023_v14 = vsel %vm3387_vm8, %v3403_v57, 0.0  ;;  %v1007_v15 = vsel %vm3281_vm0, %v3297_v44, 0.0  ;;  %v1056_v57 = vsel %vm3672_vm3, %v3696_v32, 0.0  ;;  %v1040_v44 = vsel %vm3512_vm7, %v3531_v17, 0.0 }
  0xec   : > { %vm5203_vm3 = vcmask 64512   ;;  %vm5197_vm7 = vcmask 130048  }
  0xed   : > { %v3888_v10 = vpop.permute.xlu1 %1310  ;;  %v3890_v11 = vpop.permute.xlu0 %1308 }
  0xef   : > { %1528 = vrot.lane.b32.xlu1 %v3237_v18, %s3109_s25  ;;  %1526 = vrot.lane.b32.xlu0 %v3240_v19, %s3109_s25 }
  0xf1   : > { %v3896_v12 = vpop.permute.xlu1 %1314  ;;  %v3898_v13 = vpop.permute.xlu0 %1312 }
  0xf3   : > { %1654 = vrot.lane.b32.xlu1 %v3412_v63, %s3110_s26  ;;  %1622 = vrot.lane.b32.xlu0 %v3306_v48, %s3110_s26  ;;  %v2344_v48 = vld [vmem:[%s5073_s1 + $0x40] sm:$0xff] }
  0xf4   : > { %2944 = vmatprep.subr.mxu0 %v2344_v48  ;;  %3010 = vmatprep.subr.mxu1 %v2344_v48 }
  0xf5   : > { %v3910_v18 = vpop.permute.xlu1 %1318  ;;  %v3912_v19 = vpop.permute.xlu0 %1316  ;;  %2945 = vmatpush3.msra.mxu0 %v2344_v48  ;;  %3019 = vmatpush3.msra.mxu1 %v2344_v48  ;;  %v2341_v48 = vld [vmem:[%s5073_s1 + $0x28] sm:$0xff] }
  0xf7   : > { %1656 = vrot.lane.b32.xlu1 %v1023_v14, %s3110_s26  ;;  %1624 = vrot.lane.b32.xlu0 %v1007_v15, %s3110_s26  ;;  %v2343_v14 = vld [vmem:[%s5073_s1 + $0x38] sm:$0xff]  ;;  %v2342_v15 = vld [vmem:[%s5073_s1 + $0x30] sm:$0xff] }
  0xf8   : > { %2946 = vmatprep.subr.mxu0 %v2343_v14  ;;  %3011 = vmatprep.subr.mxu1 %v2343_v14 }
  0xf9   : > { %v3925_v63 = vpop.permute.xlu1 %1322  ;;  %v3927_v8 = vpop.permute.xlu0 %1320  ;;  %2947 = vmatpush3.msra.mxu0 %v2343_v14  ;;  %3020 = vmatpush3.msra.mxu1 %v2343_v14  ;;  %v2340_v14 = vld [vmem:[%s5073_s1 + $0x20] sm:$0xff] }
  0xfa   : > { %2948 = vmatprep.subr.mxu0 %v2342_v15  ;;  %3012 = vmatprep.subr.mxu1 %v2342_v15 }
  0xfb   : > { %1782 = vrot.lane.b32.xlu1 %v1056_v57, %s3111_s5  ;;  %1750 = vrot.lane.b32.xlu0 %v1040_v44, %s3111_s5 }
  0xfc   : > { %2949 = vmatpush3.msra.mxu0 %v2342_v15  ;;  %3021 = vmatpush3.msra.mxu1 %v2342_v15  ;;  %v2339_v15 = vld [vmem:[%s5073_s1 + $0x18] sm:$0xff] }
  0xfd   : > { %v3937_v9 = vpop.permute.xlu1 %1326  ;;  %v3939_v6 = vpop.permute.xlu0 %1324  ;;  %2950 = vmatprep.subr.mxu0 %v2341_v48  ;;  %3013 = vmatprep.subr.mxu1 %v2341_v48 }
  0xfe   : > { %2951 = vmatpush3.msra.mxu0 %v2341_v48  ;;  %3022 = vmatpush3.msra.mxu1 %v2341_v48  ;;  %v2338_v48 = vld [vmem:[%s5073_s1 + $0x10] sm:$0xff] }
  0xff   : > { %1784 = vrot.lane.b32.xlu1 %v3709_v56, %s3111_s5  ;;  %1752 = vrot.lane.b32.xlu0 %v3544_v16, %s3111_s5 }
 0x100   : > { %2952 = vmatprep.subr.mxu0 %v2340_v14  ;;  %3014 = vmatprep.subr.mxu1 %v2340_v14 }
 0x101   : > { %v3948_v57 = vpop.permute.xlu1 %1330  ;;  %v3950_v44 = vpop.permute.xlu0 %1328  ;;  %2953 = vmatpush3.msra.mxu0 %v2340_v14  ;;  %3023 = vmatpush3.msra.mxu1 %v2340_v14 }
 0x102   : > { %2954 = vmatprep.subr.mxu0 %v2339_v15  ;;  %3015 = vmatprep.subr.mxu1 %v2339_v15 }
 0x103   : > { %1880 = vrot.lane.b32.xlu1 %v3250_v21, %s3112_s12  ;;  %1848 = vrot.lane.b32.xlu0 %v3176_v5, %s3112_s12  ;;  %v780_v5 = vsel %vm3546_vm6, %v3531_v17, 0.0  ;;  %vm5198_vm6 = vcmask 195584  }
 0x104   : > { %2955 = vmatpush3.msra.mxu0 %v2339_v15  ;;  %3024 = vmatpush3.msra.mxu1 %v2339_v15  ;;  %v2077_v17 = vsel %vm5203_vm3, %v780_v5, %v3509_v22  ;;  %v782_v15 = vsel %vm3567_vm14, %v3551_v59, 0.0 }
 0x105   : > { %v3962_v7 = vpop.permute.xlu1 %1398  ;;  %v3964_v26 = vpop.permute.xlu0 %1396  ;;  %2956 = vmatprep.subr.mxu0 %v2338_v48  ;;  %3016 = vmatprep.subr.mxu1 %v2338_v48 }
 0x106   : > { %5350 = vst [vmem:[#allocation83_spill] sm:$0xff] %v3962_v7  ;;  %5351 = vst [vmem:[#allocation84_spill] sm:$0xff] %v3964_v26  ;;  %v2337_v26 = vld [vmem:[%s5073_s1 + $0x8] sm:$0xff]  ;;  %2957 = vmatpush3.msra.mxu0 %v2338_v48  ;;  %3025 = vmatpush3.msra.mxu1 %v2338_v48 }
 0x107   : > { %1850 = vrot.lane.b32.xlu1 %v3173_v4, %s3112_s12  ;;  %1530 = vrot.lane.b32.xlu0 %v3250_v21, %s3109_s25  ;;  %v2336_v4 = vld [vmem:[%s5073_s1] sm:$0xff]  ;;  %v2078_v21 = vsel %vm5203_vm3, %v3544_v16, %v3507_v58  ;;  %v2080_v16 = vsel %vm5203_vm3, %v3565_v51, %v3521_v31 }
 0x108   : > { %2958 = vmatprep.subr.mxu0 %v2337_v26  ;;  %3017 = vmatprep.subr.mxu1 %v2337_v26  ;;  %v2111_v48 = vsel %vm5197_vm7, %v2078_v21, %v3826_v23 }
 0x109   : > { %v3976_v7 = vpop.permute.xlu1 %1402  ;;  %v3978_v14 = vpop.permute.xlu0 %1400  ;;  %2959 = vmatpush3.msra.mxu0 %v2337_v26  ;;  %3026 = vmatpush3.msra.mxu1 %v2337_v26  ;;  %v2079_v26 = vsel %vm5203_vm3, %v782_v15, %v3523_v40  ;;  %v2082_v40 = vsel %vm5203_vm3, %v3586_v30, %v3539_v52 }
 0x10a   : > { %5352 = vst [vmem:[#allocation85_spill] sm:$0xff] %v3976_v7  ;;  %5353 = vst [vmem:[#allocation86_spill] sm:$0xff] %v3978_v14  ;;  %v2110_v7 = vsel %vm5197_vm7, %v2077_v17, %v3828_v53  ;;  %2960 = vmatprep.subr.mxu0 %v2336_v4  ;;  %3018 = vmatprep.subr.mxu1 %v2336_v4  ;;  %v2113_v53 = vsel %vm5197_vm7, %v2080_v16, %v3832_v27  ;;  %v1093_v27 = vsel %vm3387_vm8, %v3419_v3, 0.0  ;;  %v5417_v16 = vld [vmem:[#allocation64_spill] sm:$0xff] }
 0x10b   : > { %1976 = vrot.lane.b32.xlu1 %v3323_v54, %s3113_s20  ;;  %1882 = vrot.lane.b32.xlu0 %v3247_v20, %s3112_s12  ;;  %v2084_v17 = vsel %vm5203_vm3, %v5356_v37, %v3560_v39 }
 0x10c   : > { %2961 = vmatpush3.msra.mxu0 %v2336_v4  ;;  %3027 = vmatpush3.msra.mxu1 %v2336_v4 }
 0x10d   : > { %v1407_v14 = vpop.permute.xlu1 %1406  ;;  %v1405_v29 = vpop.permute.xlu0 %1404 }
 0x10e   : > { %v4003_v58 = vsel %vm5198_vm6, %v2111_v48, %v1407_v14  ;;  %v4006_v22 = vsel %vm5198_vm6, %v2110_v7, %v1405_v29  ;;  %v784_v29 = vsel %vm3588_vm5, %v3572_v62, 0.0  ;;  %v1077_v14 = vsel %vm3281_vm0, %v3313_v50, 0.0 }
 0x10f   : > { %1532 = vrot.lane.b32.xlu1 %v3247_v20, %s3109_s25  ;;  %2008 = vrot.lane.b32.xlu0 %v3429_v25, %s3113_s20  ;;  %v2112_v20 = vsel %vm5197_vm7, %v2079_v26, %v3834_v47  ;;  %v2081_v47 = vsel %vm5203_vm3, %v784_v29, %v3541_v24  ;;  %v1025_v48 = vsel %vm3398_vm9, %v3419_v3, 0.0  ;;  %v1009_v26 = vsel %vm3292_vm1, %v3313_v50, 0.0  ;;  %v5360_v29 = vld [vmem:[#allocation36_spill] sm:$0xff]  ;;  %v5364_v50 = vld [vmem:[#allocation31_spill] sm:$0xff] }
 0x110   : > { %v2114_v52 = vsel %vm5197_vm7, %v2081_v47, %v3842_v38 }
 0x111   : > { %v1411_v23 = vpop.permute.xlu1 %1410  ;;  %v1409_v7 = vpop.permute.xlu0 %1408 }
 0x112   : > { %v4025_v5 = vsel %vm5198_vm6, %v2113_v53, %v1411_v23  ;;  %v4028_v31 = vsel %vm5198_vm6, %v2112_v20, %v1409_v7  ;;  %v5361_v53 = vld [vmem:[#allocation40_spill] sm:$0xff]  ;;  %v788_v20 = vsel %vm3630_vm4, %v5360_v29, 0.0  ;;  %v2117_v23 = vsel %vm5197_vm7, %v2084_v17, %v3848_v43  ;;  %v5370_v17 = vld [vmem:[#allocation41_spill] sm:$0xff] }
 0x113   : > { %1658 = vrot.lane.b32.xlu1 %v3429_v25, %s3110_s26  ;;  %1626 = vrot.lane.b32.xlu0 %v3323_v54, %s3110_s26  ;;  %v786_v25 = vsel %vm3609_vm13, %v3593_v49, 0.0  ;;  %v2115_v54 = vsel %vm5197_vm7, %v2082_v40, %v3840_v55  ;;  %v5357_v55 = vld [vmem:[#allocation30_spill] sm:$0xff]  ;;  %v5366_v43 = vld [vmem:[#allocation32_spill] sm:$0xff]  ;;  %vm5394_vm4 = vcmask 195584  }
 0x114   : > { %v2083_v15 = vsel %vm5203_vm3, %v786_v25, %v5357_v55  ;;  %v2085_v25 = vsel %vm5203_vm3, %v788_v20, %v5366_v43  ;;  %vm5395_vm13 = vmmov %vm5394_vm4 }
 0x115   : > { %v1415_v4 = vpop.permute.xlu1 %1414  ;;  %v1413_v24 = vpop.permute.xlu0 %1412  ;;  %v2116_v39 = vsel %vm5197_vm7, %v2083_v15, %v3850_v60  ;;  %v5367_v60 = vld [vmem:[#allocation58_spill] sm:$0xff]  ;;  %v790_v15 = vsel %vm3651_vm12, %v5370_v17, 0.0 }
 0x116   : > { %v4053_v21 = vsel %vm5198_vm6, %v2115_v54, %v1415_v4  ;;  %v4056_v42 = vsel %vm5198_vm6, %v2114_v52, %v1413_v24  ;;  %v5368_v54 = vld [vmem:[#allocation54_spill] sm:$0xff]  ;;  %v1058_v52 = vsel %vm3691_vm11, %v5367_v60, 0.0  ;;  %v1042_v24 = vsel %vm3526_vm15, %v3551_v59, 0.0  ;;  %v5374_v59 = vld [vmem:[#allocation33_spill] sm:$0xff]  ;;  %vm5405_vm11 = vmmov %vm5395_vm13 }
 0x117   : > { %5354 = vst [vmem:[#allocation87_spill] sm:$0xff] %v4053_v21  ;;  %5355 = vst [vmem:[#allocation88_spill] sm:$0xff] %v4056_v42  ;;  %2010 = vrot.lane.b32.xlu1 %v1093_v27, %s3113_s20  ;;  %1978 = vrot.lane.b32.xlu0 %v1077_v14, %s3113_s20  ;;  %v5365_v27 = vld [vmem:[#allocation39_spill] sm:$0xff]  ;;  %v5454_v21 = vld [vmem:[#allocation46_spill] sm:$0xff] }
 0x118   : > { %v2086_v14 = vsel %vm5203_vm3, %v5365_v27, %v5364_v50  ;;  %v5376_v50 = vld [vmem:[#allocation34_spill] sm:$0xff] }
 0x119   : > { %v1419_v7 = vpop.permute.xlu1 %1418  ;;  %v1417_v40 = vpop.permute.xlu0 %1416 }
 0x11a   : > { %v4079_v47 = vsel %vm5198_vm6, %v2117_v23, %v1419_v7  ;;  %v4082_v3 = vsel %vm5198_vm6, %v2116_v39, %v1417_v40  ;;  %v5375_v40 = vld [vmem:[#allocation44_spill] sm:$0xff] }
 0x11b   : > { %5362 = vst [vmem:[#allocation35_spill] sm:$0xff] %v4079_v47  ;;  %5363 = vst [vmem:[#allocation30_spill] sm:$0xff] %v4082_v3  ;;  %1660 = vrot.lane.b32.xlu1 %v1025_v48, %s3110_s26  ;;  %1628 = vrot.lane.b32.xlu0 %v1009_v26, %s3110_s26  ;;  %v2119_v48 = vsel %vm5197_vm7, %v2086_v14, %v3856_v0  ;;  %v2118_v26 = vsel %vm5197_vm7, %v2085_v25, %v3858_v2  ;;  %v5431_v47 = vld [vmem:[#allocation77_spill] sm:$0xff]  ;;  %v5452_v3 = vld [vmem:[#allocation23_spill] sm:$0xff] }
 0x11c   : > { %v2088_v0 = vsel %vm5203_vm3, %v5375_v40, %v5374_v59  ;;  %v2087_v2 = vsel %vm5203_vm3, %v790_v15, %v5376_v50  ;;  %v5383_v50 = vld [vmem:[#allocation47_spill] sm:$0xff] }
 0x11d   : > { %v1423_v23 = vpop.permute.xlu1 %1422  ;;  %v1421_v20 = vpop.permute.xlu0 %1420  ;;  %v2121_v14 = vsel %vm5197_vm7, %v2088_v0, %v3864_v1  ;;  %v2120_v43 = vsel %vm5197_vm7, %v2087_v2, %v3866_v46  ;;  %v5380_v46 = vld [vmem:[#allocation3_spill] sm:$0xff]  ;;  %v3047_v0 = vld [vmem:[%s3156_s21 + $0xb1] sm:$0xff]  ;;  %v2094_v2 = vsel %vm5203_vm3, %v3709_v56, %v5383_v50 }
 0x11e   : > { %v4105_v39 = vsel %vm5198_vm6, %v2119_v48, %v1423_v23  ;;  %v4108_v7 = vsel %vm5198_vm6, %v2118_v26, %v1421_v20  ;;  %v5379_v48 = vld [vmem:[#allocation61_spill] sm:$0xff]  ;;  %v3048_v50 = vld [vmem:[%s3156_s21 + $0xb9] sm:$0xff] }
 0x11f   : > { %5372 = vst [vmem:[#allocation13_spill] sm:$0xff] %v4105_v39  ;;  %5373 = vst [vmem:[#allocation4_spill] sm:$0xff] %v4108_v7  ;;  %1786 = vrot.lane.b32.xlu1 %v1058_v52, %s3111_s5  ;;  %1754 = vrot.lane.b32.xlu0 %v1042_v24, %s3111_s5  ;;  %v3045_v26 = vld [vmem:[%s3156_s21 + $0x31] sm:$0xff] }
 0x120   : > { %v5381_v23 = vld [vmem:[#allocation57_spill] sm:$0xff] }
 0x121   : > { %v1427_v25 = vpop.permute.xlu1 %1426  ;;  %v1425_v17 = vpop.permute.xlu0 %1424  ;;  %vm5382_vm0 = vnez %v5381_v23  ;;  %v1072_v7 = vld [vmem:[%s3156_s21 + $0x111] sm:$0xff] }
 0x122   : > { %v4122_v52 = vsel %vm5198_vm6, %v2121_v14, %v1427_v25  ;;  %v4125_v24 = vsel %vm5198_vm6, %v2120_v43, %v1425_v17  ;;  %v796_v20 = vsel %vm5382_vm0, %v3696_v32, 0.0  ;;  %v5384_v14 = vld [vmem:[#allocation48_spill] sm:$0xff]  ;;  %v5385_v32 = vld [vmem:[#allocation62_spill] sm:$0xff]  ;;  %v2127_v17 = vsel %vm5197_vm7, %v2094_v2, %v3888_v10  ;;  %v5389_v2 = vld [vmem:[#allocation53_spill] sm:$0xff] }
 0x123   : > { %5377 = vst [vmem:[#allocation36_spill] sm:$0xff] %v4122_v52  ;;  %5378 = vst [vmem:[#allocation40_spill] sm:$0xff] %v4125_v24  ;;  %1788 = vrot.lane.b32.xlu1 %v5379_v48, %s3111_s5  ;;  %1756 = vrot.lane.b32.xlu0 %v3565_v51, %s3111_s5  ;;  %v3046_v51 = vld [vmem:[%s3156_s21 + $0x39] sm:$0xff]  ;;  %v2093_v43 = vsel %vm5203_vm3, %v796_v20, %v5384_v14  ;;  %vm5386_vm8 = vnez %v5385_v32  ;;  %v5387_v20 = vld [vmem:[#allocation8_spill] sm:$0xff] }
 0x124   : > { %v798_v25 = vsel %vm5386_vm8, %v5367_v60, 0.0  ;;  %v5388_v60 = vld [vmem:[#allocation52_spill] sm:$0xff]  ;;  %v5390_v14 = vld [vmem:[#allocation63_spill] sm:$0xff] }
 0x125   : > { %v4131_v1 = vpop.permute.xlu1 %1430  ;;  %v4133_v15 = vpop.permute.xlu0 %1428  ;;  %v2096_v10 = vsel %vm5203_vm3, %v5379_v48, %v5388_v60  ;;  %v5397_v60 = vld [vmem:[#allocation55_spill] sm:$0xff] }
 0x127   : > { %1884 = vrot.lane.b32.xlu1 %v5380_v46, %s3112_s12  ;;  %1852 = vrot.lane.b32.xlu0 %v3045_v26, %s3112_s12  ;;  %v2126_v46 = vsel %vm5197_vm7, %v2093_v43, %v3890_v11  ;;  %v2095_v11 = vsel %vm5203_vm3, %v798_v25, %v5389_v2  ;;  %vm5391_vm7 = vnez %v5327_v41  ;;  %v5396_v25 = vld [vmem:[#allocation17_spill] sm:$0xff]  ;;  %v5398_v2 = vld [vmem:[#allocation66_spill] sm:$0xff] }
 0x128   : > { %v800_v43 = vsel %vm5391_vm7, %v5390_v14, 0.0 }
 0x129   : > { %v4142_v59 = vpop.permute.xlu1 %1434  ;;  %v4144_v40 = vpop.permute.xlu0 %1432 }
 0x12b   : > { %1854 = vrot.lane.b32.xlu1 %v3046_v51, %s3112_s12  ;;  %1534 = vrot.lane.b32.xlu0 %v3047_v0, %s3109_s25 }
 0x12d   : > { %v1439_v26 = vpop.permute.xlu1 %1438  ;;  %v1437_v51 = vpop.permute.xlu0 %1436 }
 0x12e   : > { %v4163_v0 = vsel %vm5198_vm6, %v2127_v17, %v1439_v26  ;;  %v4166_v56 = vsel %vm5198_vm6, %v2126_v46, %v1437_v51  ;;  %vm5392_vm6 = vcmask 130048  }
 0x12f   : > { %1980 = vrot.lane.b32.xlu1 %v5387_v20, %s3113_s20  ;;  %1886 = vrot.lane.b32.xlu0 %v3048_v50, %s3112_s12  ;;  %v2129_v17 = vsel %vm5392_vm6, %v2096_v10, %v3896_v12  ;;  %vm5393_vm12 = vmmov %vm5392_vm6  ;;  %v2098_v12 = vsel %vm5203_vm3, %v5398_v2, %v5397_v60  ;;  %v5399_v10 = vld [vmem:[#allocation56_spill] sm:$0xff]  ;;  %vm5401_vm6 = vnez %v5332_v61 }
 0x130   : > { %v2128_v46 = vsel %vm5393_vm12, %v2095_v11, %v3898_v13  ;;  %v2097_v13 = vsel %vm5203_vm3, %v800_v43, %v5399_v10  ;;  %v5400_v11 = vld [vmem:[#allocation67_spill] sm:$0xff]  ;;  %v5409_v10 = vld [vmem:[#allocation16_spill] sm:$0xff] }
 0x131   : > { %v1443_v26 = vpop.permute.xlu1 %1442  ;;  %v1441_v51 = vpop.permute.xlu0 %1440  ;;  %v5407_v43 = vld [vmem:[#allocation59_spill] sm:$0xff] }
 0x132   : > { %v4185_v52 = vsel %vm5394_vm4, %v2129_v17, %v1443_v26  ;;  %v4188_v48 = vsel %vm5395_vm13, %v2128_v46, %v1441_v51  ;;  %v802_v17 = vsel %vm5401_vm6, %v5400_v11, 0.0  ;;  %vm5402_vm4 = vmmov %vm5393_vm12 }
 0x133   : > { %1536 = vrot.lane.b32.xlu1 %v3048_v50, %s3109_s25  ;;  %2012 = vrot.lane.b32.xlu0 %v5396_v25, %s3113_s20  ;;  %v2131_v46 = vsel %vm5402_vm4, %v2098_v12, %v3910_v18  ;;  %vm5403_vm12 = vmmov %vm5402_vm4  ;;  %v2100_v18 = vsel %vm5203_vm3, %v3772_v33, %v5407_v43  ;;  %v5408_v12 = vld [vmem:[#allocation60_spill] sm:$0xff] }
 0x134   : > { %v2130_v50 = vsel %vm5403_vm12, %v2097_v13, %v3912_v19  ;;  %v2099_v19 = vsel %vm5203_vm3, %v802_v17, %v5408_v12  ;;  %v1095_v13 = vsel %vm3398_vm9, %v5409_v10, 0.0  ;;  %vm5413_vm12 = vmmov %vm5395_vm13 }
 0x135   : > { %v1447_v26 = vpop.permute.xlu1 %1446  ;;  %v1445_v51 = vpop.permute.xlu0 %1444  ;;  %vm5415_vm9 = vmmov %vm5413_vm12 }
 0x136   : > { %v4206_v24 = vsel %vm5395_vm13, %v2131_v46, %v1447_v26  ;;  %v4209_v60 = vsel %vm5405_vm11, %v2130_v50, %v1445_v51  ;;  %v5410_v46 = vld [vmem:[#allocation7_spill] sm:$0xff]  ;;  %vm5412_vm11 = vmmov %vm5402_vm4  ;;  %v2132_v51 = vsel %vm5402_vm4, %v2099_v19, %v3927_v8  ;;  %v5420_v8 = vld [vmem:[#allocation14_spill] sm:$0xff] }
 0x137   : > { %5404 = vst [vmem:[#allocation31_spill] sm:$0xff] %v4206_v24  ;;  %5406 = vst [vmem:[#allocation39_spill] sm:$0xff] %v4209_v60  ;;  %1662 = vrot.lane.b32.xlu1 %v5396_v25, %s3110_s26  ;;  %1630 = vrot.lane.b32.xlu0 %v5387_v20, %s3110_s26  ;;  %v1079_v50 = vsel %vm3292_vm1, %v5410_v46, 0.0  ;;  %v5411_v25 = vld [vmem:[#allocation70_spill] sm:$0xff]  ;;  %v2133_v26 = vsel %vm5412_vm11, %v2100_v18, %v3925_v63  ;;  %v5418_v46 = vld [vmem:[#allocation73_spill] sm:$0xff]  ;;  %vm5421_vm1 = vnez %v5420_v8 }
 0x138   : > { %v804_v20 = vsel %vm3795_vm2, %v5411_v25, 0.0  ;;  %v2102_v39 = vsel %vm5203_vm3, %v5418_v46, %v5417_v16  ;;  %v5419_v63 = vld [vmem:[#allocation65_spill] sm:$0xff]  ;;  %v1027_v19 = vsel %vm5421_vm1, %v5409_v10, 0.0  ;;  %vm5426_vm11 = vmmov %vm5402_vm4  ;;  %v3060_v24 = vld [vmem:[%s3156_s21 + $0xd9] sm:$0xff] }
 0x139   : > { %v1451_v43 = vpop.permute.xlu1 %1450  ;;  %v1449_v17 = vpop.permute.xlu0 %1448  ;;  %v2101_v18 = vsel %vm5203_vm3, %v804_v20, %v5419_v63 }
 0x13a   : > { %v4234_v12 = vsel %vm5413_vm12, %v2133_v26, %v1451_v43  ;;  %v4237_v38 = vsel %vm5415_vm9, %v2132_v51, %v1449_v17  ;;  %v3049_v26 = vld [vmem:[%s3156_s21 + $0x3a] sm:$0xff]  ;;  %v5422_v43 = vld [vmem:[#allocation5_spill] sm:$0xff]  ;;  %v2134_v16 = vsel %vm5402_vm4, %v2101_v18, %v3939_v6  ;;  %vm5427_vm12 = vmmov %vm5415_vm9  ;;  %v1060_v6 = vsel %vm5382_vm0, %v5390_v14, 0.0 }
 0x13b   : > { %5414 = vst [vmem:[#allocation32_spill] sm:$0xff] %v4234_v12  ;;  %5416 = vst [vmem:[#allocation58_spill] sm:$0xff] %v4237_v38  ;;  %2014 = vrot.lane.b32.xlu1 %v1095_v13, %s3113_s20  ;;  %1982 = vrot.lane.b32.xlu0 %v1079_v50, %s3113_s20  ;;  %vm5423_vm13 = vnez %v5422_v43  ;;  %v5424_v17 = vld [vmem:[#allocation74_spill] sm:$0xff]  ;;  %v2135_v50 = vsel %vm5426_vm11, %v2102_v39, %v3937_v9  ;;  %v5432_v9 = vld [vmem:[#allocation69_spill] sm:$0xff]  ;;  %vm5433_vm11 = vnez %v5270_v45 }
 0x13c   : > { %v1011_v51 = vsel %vm5423_vm13, %v3049_v26, 0.0  ;;  %v806_v13 = vsel %vm3816_vm10, %v5424_v17, 0.0  ;;  %v5430_v26 = vld [vmem:[#allocation68_spill] sm:$0xff] }
 0x13d   : > { %v1455_v12 = vpop.permute.xlu1 %1454  ;;  %v1453_v20 = vpop.permute.xlu0 %1452  ;;  %v2104_v38 = vsel %vm5203_vm3, %v5431_v47, %v5430_v26  ;;  %v2103_v39 = vsel %vm5203_vm3, %v806_v13, %v5432_v9  ;;  %vm5436_vm3 = vmmov %vm5415_vm9  ;;  %v3050_v14 = vld [vmem:[%s3156_s21 + $0xc1] sm:$0xff]  ;;  %v3052_v26 = vld [vmem:[%s3156_s21 + $0x49] sm:$0xff] }
 0x13e   : > { %v4260_v63 = vsel %vm5427_vm12, %v2135_v50, %v1455_v12  ;;  %v4263_v10 = vsel %vm5415_vm9, %v2134_v16, %v1453_v20  ;;  %v1044_v12 = vsel %vm5433_vm11, %v3572_v62, 0.0  ;;  %v2137_v18 = vsel %vm5402_vm4, %v2104_v38, %v3948_v57  ;;  %vm5434_vm12 = vmmov %vm5402_vm4  ;;  %v3051_v38 = vld [vmem:[%s3156_s21 + $0x41] sm:$0xff] }
 0x13f   : > { %5428 = vst [vmem:[#allocation54_spill] sm:$0xff] %v4260_v63  ;;  %5429 = vst [vmem:[#allocation29_spill] sm:$0xff] %v4263_v10  ;;  %1664 = vrot.lane.b32.xlu1 %v1027_v19, %s3110_s26  ;;  %1632 = vrot.lane.b32.xlu0 %v1011_v51, %s3110_s26  ;;  %v2136_v19 = vsel %vm5434_vm12, %v2103_v39, %v3950_v44  ;;  %v3053_v9 = vld [vmem:[%s3156_s21 + $0x42] sm:$0xff]  ;;  %v3058_v10 = vld [vmem:[%s3156_s21 + $0x59] sm:$0xff] }
 0x140   : > { %v3054_v39 = vld [vmem:[%s3156_s21 + $0xc9] sm:$0xff]  ;;  %vm5458_vm11 = vmmov %vm5402_vm4  ;;  %vm2204_vm4 = vcmask 326656  }
 0x141   : > { %v1459_v51 = vpop.permute.xlu1 %1458  ;;  %v1457_v50 = vpop.permute.xlu0 %1456  ;;  %vm5460_vm12 = vmmov %vm5415_vm9 }
 0x142   : > { %v4283_v13 = vsel %vm5415_vm9, %v2137_v18, %v1459_v51  ;;  %v4286_v23 = vsel %vm5436_vm3, %v2136_v19, %v1457_v50  ;;  %v5440_v18 = vld [vmem:[#allocation20_spill] sm:$0xff]  ;;  %v5443_v50 = vld [vmem:[#allocation19_spill] sm:$0xff]  ;;  %vm2237_vm9 = vcmask 392192  }
 0x143   : > { %5435 = vst [vmem:[#allocation41_spill] sm:$0xff] %v4283_v13  ;;  %5437 = vst [vmem:[#allocation33_spill] sm:$0xff] %v4286_v23  ;;  %1790 = vrot.lane.b32.xlu1 %v1060_v6, %s3111_s5  ;;  %1758 = vrot.lane.b32.xlu0 %v1044_v12, %s3111_s5  ;;  %v5448_v23 = vld [vmem:[#allocation6_spill] sm:$0xff] }
 0x144   : > { %vm5449_vm0 = vnez %v5448_v23  ;;  %v5468_v23 = vld [vmem:[#allocation71_spill] sm:$0xff] }
 0x145   : > { %v4290_v45 = vpop.permute.xlu1 %1496  ;;  %v4292_v62 = vpop.permute.xlu0 %1494 }
 0x147   : > { %1792 = vrot.lane.b32.xlu1 %v5398_v2, %s3111_s5  ;;  %1760 = vrot.lane.b32.xlu0 %v3586_v30, %s3111_s5 }
 0x149   : > { %v4298_v57 = vpop.permute.xlu1 %1500  ;;  %v4300_v44 = vpop.permute.xlu0 %1498 }
 0x14b   : > { %1888 = vrot.lane.b32.xlu1 %v3050_v14, %s3112_s12  ;;  %1856 = vrot.lane.b32.xlu0 %v3051_v38, %s3112_s12  ;;  %v3055_v38 = vld [vmem:[%s3156_s21 + $0x4a] sm:$0xff] }
 0x14c   : > { %v1013_v8 = vsel %vm5449_vm0, %v3055_v38, 0.0 }
 0x14d   : > { %v4306_v16 = vpop.permute.xlu1 %1504  ;;  %v4308_v20 = vpop.permute.xlu0 %1502 }
 0x14f   : > { %1858 = vrot.lane.b32.xlu1 %v3052_v26, %s3112_s12  ;;  %1538 = vrot.lane.b32.xlu0 %v3050_v14, %s3109_s25  ;;  %v1097_v14 = vsel %vm5421_vm1, %v5443_v50, 0.0  ;;  %v1081_v26 = vsel %vm5423_vm13, %v3055_v38, 0.0  ;;  %vm2171_vm1 = vcmask 261120  }
 0x151   : > { %v4313_v30 = vpop.permute.xlu1 %1508  ;;  %v4315_v2 = vpop.permute.xlu0 %1506 }
 0x153   : > { %1984 = vrot.lane.b32.xlu1 %v3053_v9, %s3113_s20  ;;  %1890 = vrot.lane.b32.xlu0 %v3054_v39, %s3112_s12 }
 0x155   : > { %v4321_v6 = vpop.permute.xlu1 %1512  ;;  %v4323_v12 = vpop.permute.xlu0 %1510 }
 0x156   : > { %5438 = vst [vmem:[#allocation44_spill] sm:$0xff] %v4321_v6  ;;  %5439 = vst [vmem:[#allocation34_spill] sm:$0xff] %v4323_v12  ;;  %v5457_v6 = vld [vmem:[#allocation72_spill] sm:$0xff]  ;;  %v5461_v12 = vld [vmem:[#allocation38_spill] sm:$0xff] }
 0x157   : > { %1540 = vrot.lane.b32.xlu1 %v3054_v39, %s3109_s25  ;;  %2016 = vrot.lane.b32.xlu0 %v5440_v18, %s3113_s20 }
 0x159   : > { %v4328_v19 = vpop.permute.xlu1 %1516  ;;  %v4330_v51 = vpop.permute.xlu0 %1514 }
 0x15a   : > { %5441 = vst [vmem:[#allocation61_spill] sm:$0xff] %v4328_v19  ;;  %5442 = vst [vmem:[#allocation3_spill] sm:$0xff] %v4330_v51 }
 0x15b   : > { %1666 = vrot.lane.b32.xlu1 %v5440_v18, %s3110_s26  ;;  %1634 = vrot.lane.b32.xlu0 %v3053_v9, %s3110_s26  ;;  %v5446_v18 = vld [vmem:[#allocation15_spill] sm:$0xff] }
 0x15c   : > { %vm5447_vm3 = vnez %v5446_v18 }
 0x15d   : > { %v4341_v39 = vpop.permute.xlu1 %1520  ;;  %v4343_v13 = vpop.permute.xlu0 %1518  ;;  %v1029_v9 = vsel %vm5447_vm3, %v5443_v50, 0.0  ;;  %v1046_v50 = vsel %vm3567_vm14, %v3593_v49, 0.0  ;;  %v3056_v49 = vld [vmem:[%s3156_s21 + $0xd1] sm:$0xff] }
 0x15e   : > { %5444 = vst [vmem:[#allocation57_spill] sm:$0xff] %v4341_v39  ;;  %5445 = vst [vmem:[#allocation47_spill] sm:$0xff] %v4343_v13 }
 0x15f   : > { %2018 = vrot.lane.b32.xlu1 %v1097_v14, %s3113_s20  ;;  %1986 = vrot.lane.b32.xlu0 %v1081_v26, %s3113_s20  ;;  %v1062_v14 = vsel %vm5386_vm8, %v5400_v11, 0.0  ;;  %v3057_v11 = vld [vmem:[%s3156_s21 + $0x51] sm:$0xff]  ;;  %vm5453_vm8 = vcmask 64512  }
 0x161   : > { %v4352_v63 = vpop.permute.xlu1 %1528  ;;  %v1527_v43 = vpop.permute.xlu0 %1526 }
 0x163   : > { %1668 = vrot.lane.b32.xlu1 %v1029_v9, %s3110_s26  ;;  %1636 = vrot.lane.b32.xlu0 %v1013_v8, %s3110_s26  ;;  %v680_v8 = vld [vmem:[%s3156_s21] sm:$0xff] }
 0x165   : > { %v1655_v26 = vpop.permute.xlu1 %1654  ;;  %v1623_v38 = vpop.permute.xlu0 %1622 }
 0x167   : > { %1794 = vrot.lane.b32.xlu1 %v1062_v14, %s3111_s5  ;;  %1762 = vrot.lane.b32.xlu0 %v1046_v50, %s3111_s5 }
 0x169   : > { %v4364_v9 = vpop.permute.xlu1 %1656  ;;  %v4366_v39 = vpop.permute.xlu0 %1624 }
 0x16b   : > { %1796 = vrot.lane.b32.xlu1 %v3772_v33, %s3111_s5  ;;  %1764 = vrot.lane.b32.xlu0 %v5356_v37, %s3111_s5  ;;  %v5450_v33 = vld [vmem:[#allocation28_spill] sm:$0xff] }
 0x16c   : > { %vm5451_vm14 = vnez %v5450_v33  ;;  %v5459_v33 = vld [vmem:[#allocation84_spill] sm:$0xff] }
 0x16d   : > { %v1783_v34 = vpop.permute.xlu1 %1782  ;;  %v1751_v32 = vpop.permute.xlu0 %1750  ;;  %v776_v37 = vsel %vm5451_vm14, %v680_v8, 0.0  ;;  %vm5205_vm14 = vcmask 457728  }
 0x16e   : > { %v2073_v51 = vsel %vm5453_vm8, %v776_v37, %v5452_v3 }
 0x16f   : > { %1892 = vrot.lane.b32.xlu1 %v3056_v49, %s3112_s12  ;;  %1860 = vrot.lane.b32.xlu0 %v3057_v11, %s3112_s12  ;;  %v3059_v11 = vld [vmem:[%s3156_s21 + $0x52] sm:$0xff]  ;;  %v2106_v8 = vsel %vm5458_vm11, %v2073_v51, %v5457_v6  ;;  %v5462_v51 = vld [vmem:[#allocation80_spill] sm:$0xff] }
 0x170   : > { %v2139_v60 = vsel %vm5460_vm12, %v2106_v8, %v5459_v33  ;;  %v3061_v6 = vld [vmem:[%s3156_s21 + $0xd2] sm:$0xff]  ;;  %v3063_v33 = vld [vmem:[%s3156_s21 + $0x5a] sm:$0xff] }
 0x171   : > { %v4377_v14 = vpop.permute.xlu1 %1784  ;;  %v4379_v50 = vpop.permute.xlu0 %1752  ;;  %v2172_v42 = vsel %vm2171_vm1, %v2139_v60, %v4292_v62 }
 0x173   : > { %1862 = vrot.lane.b32.xlu1 %v3058_v10, %s3112_s12  ;;  %1542 = vrot.lane.b32.xlu0 %v3056_v49, %s3109_s25  ;;  %v5455_v10 = vld [vmem:[#allocation50_spill] sm:$0xff] }
 0x174   : > { %vm5456_vm13 = vnez %v5455_v10 }
 0x175   : > { %v1881_v13 = vpop.permute.xlu1 %1880  ;;  %v1849_v19 = vpop.permute.xlu0 %1848  ;;  %v792_v49 = vsel %vm5456_vm13, %v5454_v21, 0.0  ;;  %v2205_v21 = vsel %vm2204_vm4, %v2172_v42, %v1623_v38  ;;  %vm5204_vm13 = vcmask 523264  }
 0x176   : > { %v2089_v55 = vsel %vm5453_vm8, %v792_v49, %v5461_v12  ;;  %v2238_v8 = vsel %vm2237_vm9, %v2205_v21, %v1751_v32  ;;  %vm2352_vm8 = vcmask 588800  }
 0x177   : > { %1988 = vrot.lane.b32.xlu1 %v3059_v11, %s3113_s20  ;;  %1894 = vrot.lane.b32.xlu0 %v3060_v24, %s3112_s12  ;;  %v2122_v10 = vsel %vm5458_vm11, %v2089_v55, %v5462_v51  ;;  %v2271_v62 = vsel %vm5205_vm14, %v2238_v8, %v1849_v19  ;;  %v681_v55 = vld [vmem:[%s3156_s21 + $0x8] sm:$0xff]  ;;  %v5463_v51 = vld [vmem:[#allocation26_spill] sm:$0xff]  ;;  %vm5464_vm11 = vcmask 64512   ;;  %v5466_v8 = vld [vmem:[#allocation49_spill] sm:$0xff] }
 0x178   : > { %v2155_v60 = vsel %vm5460_vm12, %v2122_v10, %v4133_v15  ;;  %v3062_v15 = vld [vmem:[%s3156_s21 + $0xda] sm:$0xff]  ;;  %v5465_v10 = vld [vmem:[#allocation37_spill] sm:$0xff]  ;;  %vm5467_vm12 = vmmov %vm5464_vm11 }
 0x179   : > { %v1851_v3 = vpop.permute.xlu1 %1850  ;;  %v4399_v37 = vpop.permute.xlu0 %1530  ;;  %v1099_v19 = vsel %vm5447_vm3, %v3062_v15, 0.0  ;;  %vm5469_vm3 = vcmask 130048  }
 0x17b   : > { %1544 = vrot.lane.b32.xlu1 %v3060_v24, %s3109_s25  ;;  %2020 = vrot.lane.b32.xlu0 %v3061_v6, %s3113_s20  ;;  %v2188_v24 = vsel %vm2171_vm1, %v2155_v60, %v1527_v43  ;;  %v1083_v43 = vsel %vm5449_vm0, %v3063_v33, 0.0  ;;  %v2090_v60 = vsel %vm5467_vm12, %v5466_v8, %v5465_v10  ;;  %vm5471_vm0 = vmmov %vm5469_vm3  ;;  %vm5477_vm12 = vcmask 195584  }
 0x17c   : > { %v2221_v49 = vsel %vm2204_vm4, %v2188_v24, %v1655_v26 }
 0x17d   : > { %v1977_v42 = vpop.permute.xlu1 %1976  ;;  %v1883_v12 = vpop.permute.xlu0 %1882  ;;  %v2254_v32 = vsel %vm2237_vm9, %v2221_v49, %v1783_v34  ;;  %v2074_v34 = vsel %vm5464_vm11, %v681_v55, %v5463_v51  ;;  %v5476_v55 = vld [vmem:[#allocation83_spill] sm:$0xff] }
 0x17e   : > { %v2304_v38 = vsel %vm5204_vm13, %v2271_v62, %v1977_v42  ;;  %v2287_v21 = vsel %vm5205_vm14, %v2254_v32, %v1881_v13  ;;  %v2107_v18 = vsel %vm5469_vm3, %v2074_v34, %v5468_v23  ;;  %v5470_v13 = vld [vmem:[#allocation79_spill] sm:$0xff]  ;;  %v5472_v42 = vld [vmem:[#allocation18_spill] sm:$0xff]  ;;  %vm5478_vm14 = vmmov %vm5477_vm12 }
 0x17f   : > { %1670 = vrot.lane.b32.xlu1 %v3061_v6, %s3110_s26  ;;  %1638 = vrot.lane.b32.xlu0 %v3059_v11, %s3110_s26  ;;  %v2123_v62 = vsel %vm5471_vm0, %v2090_v60, %v5470_v13  ;;  %v2140_v32 = vsel %vm5477_vm12, %v2107_v18, %v5476_v55  ;;  %vm5481_vm0 = vcmask 523264   ;;  %v3066_v23 = vld [vmem:[%s3156_s21 + $0x69] sm:$0xff] }
 0x180   : > { %2962 = vmatprep.mubr.msk.f32.mxu0 %vm2352_vm8, %v2304_v38  ;;  %v5474_v38 = vld [vmem:[#allocation9_spill] sm:$0xff]  ;;  %vm5482_vm12 = vmmov %vm5481_vm0 }
 0x181   : > { %v4430_v26 = vpop.permute.xlu1 %1532  ;;  %v2009_v6 = vpop.permute.xlu0 %2008  ;;  %vm5475_vm11 = vnez %v5474_v38  ;;  %v3069_v55 = vld [vmem:[%s3156_s21 + $0xe9] sm:$0xff]  ;;  %v5503_v38 = vld [vmem:[#allocation75_spill] sm:$0xff] }
 0x182   : > { %v2320_v11 = vsel %vm5204_vm13, %v2287_v21, %v2009_v6  ;;  %vm5473_vm13 = vnez %v5472_v42  ;;  %v1015_v49 = vsel %vm5475_vm11, %v3063_v33, 0.0  ;;  %v2173_v6 = vsel %vm2171_vm1, %v2140_v32, %v4290_v45  ;;  %v5485_v32 = vld [vmem:[#allocation51_spill] sm:$0xff] }
 0x183   : > { %2022 = vrot.lane.b32.xlu1 %v1099_v19, %s3113_s20  ;;  %1990 = vrot.lane.b32.xlu0 %v1083_v43, %s3113_s20  ;;  %v1031_v24 = vsel %vm5473_vm13, %v3062_v15, 0.0  ;;  %v2156_v19 = vsel %vm5478_vm14, %v2123_v62, %v4131_v1  ;;  %v2206_v33 = vsel %vm2204_vm4, %v2173_v6, %v4366_v39  ;;  %v1048_v45 = vsel %vm3588_vm5, %v5360_v29, 0.0  ;;  %v5483_v62 = vld [vmem:[#allocation22_spill] sm:$0xff]  ;;  %v5487_v6 = vld [vmem:[#allocation76_spill] sm:$0xff] }
 0x184   : > { %2986 = vmatprep.mubr.msk.f32.mxu1 %vm2352_vm8, %v2320_v11  ;;  %v2189_v11 = vsel %vm2171_vm1, %v2156_v19, %v4352_v63  ;;  %v2239_v51 = vsel %vm2237_vm9, %v2206_v33, %v4379_v50  ;;  %v1064_v63 = vsel %vm5391_vm7, %v5411_v25, 0.0  ;;  %vm5479_vm14 = vcmask 457728  }
 0x185   : > { %v4453_v43 = vpop.permute.xlu1 %1658  ;;  %v1627_v21 = vpop.permute.xlu0 %1626  ;;  %v2222_v15 = vsel %vm2204_vm4, %v2189_v11, %v4364_v9  ;;  %v2272_v39 = vsel %vm5479_vm14, %v2239_v51, %v1851_v3  ;;  %vm5480_vm3 = vmmov %vm5479_vm14  ;;  %v3064_v3 = vld [vmem:[%s3156_s21 + $0xe1] sm:$0xff]  ;;  %vm5484_vm5 = vcmask 64512   ;;  %vm5486_vm7 = vnez %v5368_v54  ;;  %v5489_v11 = vld [vmem:[#allocation86_spill] sm:$0xff] }
 0x186   : > { %v2255_v1 = vsel %vm2237_vm9, %v2222_v15, %v4377_v14  ;;  %v794_v19 = vsel %vm5486_vm7, %v5485_v32, 0.0  ;;  %vm5488_vm14 = vcmask 130048   ;;  %v3070_v54 = vld [vmem:[%s3156_s21 + $0xe2] sm:$0xff]  ;;  %vm5497_vm7 = vcmask 523264   ;;  %v4557_v32 = vld [vmem:[%s3156_s21 + $0x98] sm:$0xff] }
 0x187   : > { %1672 = vrot.lane.b32.xlu1 %v1031_v24, %s3110_s26  ;;  %1640 = vrot.lane.b32.xlu0 %v1015_v49, %s3110_s26  ;;  %v2288_v9 = vsel %vm5480_vm3, %v2255_v1, %v1883_v12  ;;  %v3065_v12 = vld [vmem:[%s3156_s21 + $0x61] sm:$0xff]  ;;  %vm5492_vm3 = vmmov %vm5484_vm5 }
 0x188   : > { %v3068_v49 = vld [vmem:[%s3156_s21 + $0x62] sm:$0xff] }
 0x189   : > { %v2011_v34 = vpop.permute.xlu1 %2010  ;;  %v1979_v10 = vpop.permute.xlu0 %1978 }
 0x18a   : > { %v2321_v14 = vsel %vm5481_vm0, %v2288_v9, %v2011_v34  ;;  %v2305_v50 = vsel %vm5482_vm12, %v2272_v39, %v1979_v10  ;;  %v5493_v9 = vld [vmem:[#allocation82_spill] sm:$0xff]  ;;  %vm5494_vm0 = vmmov %vm5488_vm14 }
 0x18b   : > { %1798 = vrot.lane.b32.xlu1 %v1064_v63, %s3111_s5  ;;  %1766 = vrot.lane.b32.xlu0 %v1048_v45, %s3111_s5  ;;  %v5491_v63 = vld [vmem:[#allocation43_spill] sm:$0xff] }
 0x18c   : > { %2963 = vmatmul.mubr.msk.f32.vlgmr.msra.gmra.mxu0 %vm2352_vm8, %v2305_v50  ;;  %2987 = vmatmul.mubr.msk.f32.vlgmr.msra.gmra.mxu1 %vm2352_vm8, %v2321_v14  ;;  %v2091_v45 = vsel %vm5492_vm3, %v794_v19, %v5491_v63  ;;  %v5501_v19 = vld [vmem:[#allocation42_spill] sm:$0xff] }
 0x18d   : > { %v4483_v36 = vpop.permute.xlu1 %1660  ;;  %v4485_v41 = vpop.permute.xlu0 %1628  ;;  %v2124_v34 = vsel %vm5494_vm0, %v2091_v45, %v5493_v9  ;;  %v5510_v45 = vld [vmem:[#allocation85_spill] sm:$0xff] }
 0x18f   : > { %1800 = vrot.lane.b32.xlu1 %v5418_v46, %s3111_s5  ;;  %1768 = vrot.lane.b32.xlu0 %v5365_v27, %s3111_s5  ;;  %v3067_v27 = vld [vmem:[%s3156_s21 + $0x10] sm:$0xff] }
 0x190   : > { %v778_v46 = vsel %vm3526_vm15, %v3067_v27, 0.0  ;;  %vm5490_vm15 = vcmask 195584  }
 0x191   : > { %v1787_v29 = vpop.permute.xlu1 %1786  ;;  %v1755_v25 = vpop.permute.xlu0 %1754  ;;  %v2075_v24 = vsel %vm5484_vm5, %v778_v46, %v5483_v62  ;;  %vm5495_vm12 = vmmov %vm5490_vm15  ;;  %vm5496_vm5 = vcmask 457728   ;;  %v3072_v46 = vld [vmem:[%s3156_s21 + $0x6a] sm:$0xff] }
 0x192   : > { %v2108_v4 = vsel %vm5488_vm14, %v2075_v24, %v5487_v6  ;;  %vm5498_vm14 = vmmov %vm5496_vm5  ;;  %v5505_v6 = vld [vmem:[#allocation81_spill] sm:$0xff] }
 0x193   : > { %1896 = vrot.lane.b32.xlu1 %v3064_v3, %s3112_s12  ;;  %1864 = vrot.lane.b32.xlu0 %v3065_v12, %s3112_s12  ;;  %v2141_v15 = vsel %vm5490_vm15, %v2108_v4, %v5489_v11  ;;  %vm5499_vm15 = vmmov %vm5497_vm7  ;;  %v5506_v11 = vld [vmem:[#allocation21_spill] sm:$0xff] }
 0x194   : > { %v2174_v51 = vsel %vm2171_vm1, %v2141_v15, %v4300_v44  ;;  %v2157_v44 = vsel %vm5495_vm12, %v2124_v34, %v4144_v40  ;;  %vm5507_vm12 = vnez %v5506_v11  ;;  %v5522_v11 = vld [vmem:[#allocation24_spill] sm:$0xff] }
 0x195   : > { %v4495_v8 = vpop.permute.xlu1 %1788  ;;  %v4497_v60 = vpop.permute.xlu0 %1756  ;;  %v2207_v39 = vsel %vm2204_vm4, %v2174_v51, %v1627_v21  ;;  %v2190_v21 = vsel %vm2171_vm1, %v2157_v44, %v4399_v37  ;;  %v1085_v37 = vsel %vm5475_vm11, %v3072_v46, 0.0  ;;  %vm5504_vm11 = vmmov %vm5494_vm0  ;;  %v5508_v51 = vld [vmem:[#allocation10_spill] sm:$0xff] }
 0x196   : > { %v2240_v10 = vsel %vm2237_vm9, %v2207_v39, %v1755_v25  ;;  %v3071_v25 = vld [vmem:[%s3156_s21 + $0xea] sm:$0xff] }
 0x197   : > { %1866 = vrot.lane.b32.xlu1 %v3066_v23, %s3112_s12  ;;  %1546 = vrot.lane.b32.xlu0 %v3064_v3, %s3109_s25  ;;  %v2223_v23 = vsel %vm2204_vm4, %v2190_v21, %v4453_v43  ;;  %v1101_v27 = vsel %vm5473_vm13, %v3071_v25, 0.0  ;;  %vm5502_vm13 = vmmov %vm5492_vm3  ;;  %v1033_v15 = vsel %vm5507_vm12, %v3071_v25, 0.0  ;;  %v3077_v25 = vld [vmem:[%s3156_s21 + $0xf1] sm:$0xff] }
 0x198   : > { %v2256_v40 = vsel %vm2237_vm9, %v2223_v23, %v1787_v29  ;;  %v2092_v42 = vsel %vm5502_vm13, %v4557_v32, %v5501_v19  ;;  %v2176_v19 = vsel %vm2171_vm1, %v4006_v22, %v4308_v20 }
 0x199   : > { %v1885_v18 = vpop.permute.xlu1 %1884  ;;  %v1853_v13 = vpop.permute.xlu0 %1852  ;;  %v2125_v4 = vsel %vm5494_vm0, %v2092_v42, %v5505_v6 }
 0x19a   : > { %v2273_v14 = vsel %vm5496_vm5, %v2240_v10, %v1853_v13  ;;  %v2289_v13 = vsel %vm5498_vm14, %v2256_v40, %v1885_v18  ;;  %vm5509_vm5 = vnez %v5508_v51  ;;  %v5524_v51 = vld [vmem:[#allocation11_spill] sm:$0xff] }
 0x19b   : > { %1992 = vrot.lane.b32.xlu1 %v3068_v49, %s3113_s20  ;;  %1898 = vrot.lane.b32.xlu0 %v3069_v55, %s3112_s12  ;;  %v1017_v63 = vsel %vm5509_vm5, %v3072_v46, 0.0 }
 0x19d   : > { %v1855_v33 = vpop.permute.xlu1 %1854  ;;  %v4518_v1 = vpop.permute.xlu0 %1534 }
 0x19f   : > { %1548 = vrot.lane.b32.xlu1 %v3069_v55, %s3109_s25  ;;  %2024 = vrot.lane.b32.xlu0 %v3070_v54, %s3113_s20  ;;  %v5500_v55 = vld [vmem:[#allocation25_spill] sm:$0xff] }
 0x1a1   : > { %v1981_v50 = vpop.permute.xlu1 %1980  ;;  %v1887_v3 = vpop.permute.xlu0 %1886 }
 0x1a2   : > { %v2306_v12 = vsel %vm5497_vm7, %v2273_v14, %v1981_v50  ;;  %vm5511_vm7 = vcmask 195584  }
 0x1a3   : > { %1674 = vrot.lane.b32.xlu1 %v3070_v54, %s3110_s26  ;;  %1642 = vrot.lane.b32.xlu0 %v3068_v49, %s3110_s26  ;;  %v3073_v49 = vld [vmem:[%s3156_s21 + $0x18] sm:$0xff]  ;;  %vm5512_vm14 = vmmov %vm5511_vm7 }
 0x1a4   : > { %2965 = vmatprep.mubr.msk.f32.mxu0 %vm2352_vm8, %v2306_v12  ;;  %v2076_v29 = vsel %vm5492_vm3, %v3073_v49, %v5500_v55  ;;  %v2158_v54 = vsel %vm5512_vm14, %v2125_v4, %v4142_v59  ;;  %vm5514_vm3 = vcmask 457728   ;;  %v3081_v49 = vld [vmem:[%s3156_s21 + $0xf9] sm:$0xff] }
 0x1a5   : > { %v4550_v62 = vpop.permute.xlu1 %1536  ;;  %v2013_v43 = vpop.permute.xlu0 %2012  ;;  %v2109_v18 = vsel %vm5504_vm11, %v2076_v29, %v5503_v38  ;;  %v2191_v44 = vsel %vm2171_vm1, %v2158_v54, %v4430_v26  ;;  %v3075_v26 = vld [vmem:[%s3156_s21 + $0x70] sm:$0xff]  ;;  %vm5515_vm13 = vmmov %vm5514_vm3  ;;  %vm5516_vm11 = vcmask 523264  }
 0x1a6   : > { %v2322_v24 = vsel %vm5499_vm15, %v2289_v13, %v2013_v43  ;;  %v2142_v39 = vsel %vm5511_vm7, %v2109_v18, %v5510_v45  ;;  %v2224_v14 = vsel %vm2204_vm4, %v2191_v44, %v4483_v36  ;;  %vm5513_vm15 = vnez %v5282_v28  ;;  %vm5517_vm0 = vmmov %vm5516_vm11  ;;  %v3079_v13 = vld [vmem:[%s3156_s21 + $0x79] sm:$0xff] }
 0x1a7   : > { %2026 = vrot.lane.b32.xlu1 %v1101_v27, %s3113_s20  ;;  %1994 = vrot.lane.b32.xlu0 %v1085_v37, %s3113_s20  ;;  %v2175_v10 = vsel %vm2171_vm1, %v2142_v39, %v4298_v57  ;;  %v2257_v59 = vsel %vm2237_vm9, %v2224_v14, %v4495_v8  ;;  %v1066_v57 = vsel %vm5401_vm6, %v5424_v17, 0.0  ;;  %v1050_v36 = vsel %vm5513_vm15, %v3075_v26, 0.0  ;;  %v3076_v17 = vld [vmem:[%s3156_s21 + $0x78] sm:$0xff]  ;;  %vm5518_vm6 = vmmov %vm5514_vm3 }
 0x1a8   : > { %2989 = vmatprep.mubr.msk.f32.mxu1 %vm2352_vm8, %v2322_v24  ;;  %v2208_v50 = vsel %vm2204_vm4, %v2175_v10, %v4485_v41  ;;  %v2290_v12 = vsel %vm5515_vm13, %v2257_v59, %v1887_v3  ;;  %v3078_v27 = vld [vmem:[%s3156_s21 + $0x71] sm:$0xff]  ;;  %vm5519_vm7 = vmmov %vm5517_vm0  ;;  %v3083_v39 = vld [vmem:[%s3156_s21 + $0xfa] sm:$0xff]  ;;  %v2193_v26 = vsel %vm2171_vm1, %v4163_v0, %v4550_v62 }
 0x1a9   : > { %v1663_v9 = vpop.permute.xlu1 %1662  ;;  %v1631_v34 = vpop.permute.xlu0 %1630  ;;  %v2241_v21 = vsel %vm2237_vm9, %v2208_v50, %v4497_v60  ;;  %v3080_v24 = vld [vmem:[%s3156_s21 + $0x72] sm:$0xff]  ;;  %v1103_v54 = vsel %vm5507_vm12, %v3083_v39, 0.0  ;;  %vm5520_vm14 = vmmov %vm5514_vm3  ;;  %vm5523_vm12 = vnez %v5522_v11 }
 0x1aa   : > { %v2274_v41 = vsel %vm5514_vm3, %v2241_v21, %v1855_v33  ;;  %v2209_v42 = vsel %vm2204_vm4, %v2176_v19, %v1631_v34  ;;  %v3082_v38 = vld [vmem:[%s3156_s21 + $0xf2] sm:$0xff]  ;;  %v3084_v34 = vld [vmem:[%s3156_s21 + $0x7a] sm:$0xff]  ;;  %vm5521_vm15 = vmmov %vm5517_vm0  ;;  %v1035_v14 = vsel %vm5523_vm12, %v3083_v39, 0.0  ;;  %vm5526_vm3 = vnez %v5361_v53 }
 0x1ab   : > { %1676 = vrot.lane.b32.xlu1 %v1033_v15, %s3110_s26  ;;  %1644 = vrot.lane.b32.xlu0 %v1017_v63, %s3110_s26  ;;  %v2192_v63 = vsel %vm2171_vm1, %v4166_v56, %v4518_v1  ;;  %v1087_v56 = vsel %vm5509_vm5, %v3084_v34, 0.0  ;;  %vm5525_vm5 = vnez %v5524_v51  ;;  %vm5527_vm13 = vmmov %vm5518_vm6  ;;  %v1004_v19 = vld [vmem:[%s3156_s21 + $0x102] sm:$0xff] }
 0x1ac   : > { %v2225_v20 = vsel %vm2204_vm4, %v2192_v63, %v1663_v9  ;;  %v1019_v50 = vsel %vm5525_vm5, %v3084_v34, 0.0 }
 0x1ad   : > { %v2015_v23 = vpop.permute.xlu1 %2014  ;;  %v1983_v40 = vpop.permute.xlu0 %1982 }
 0x1ae   : > { %v2323_v8 = vsel %vm5516_vm11, %v2290_v12, %v2015_v23  ;;  %v2307_v60 = vsel %vm5517_vm0, %v2274_v41, %v1983_v40  ;;  %v3085_v40 = vld [vmem:[%s3156_s21 + $0x100] sm:$0xff]  ;;  %vm5528_vm11 = vmmov %vm5518_vm6 }
 0x1af   : > { %1802 = vrot.lane.b32.xlu1 %v1066_v57, %s3111_s5  ;;  %1770 = vrot.lane.b32.xlu0 %v1050_v36, %s3111_s5  ;;  %v2177_v57 = vsel %vm2171_vm1, %v4003_v58, %v4306_v16  ;;  %v1068_v58 = vsel %vm3795_vm2, %v3085_v40, 0.0  ;;  %v3086_v16 = vld [vmem:[%s3156_s21 + $0x80] sm:$0xff]  ;;  %vm5530_vm2 = vmmov %vm5528_vm11  ;;  %v1038_v40 = vld [vmem:[%s3156_s21 + $0x110] sm:$0xff] }
 0x1b0   : > { %2966 = vmatmul.mubr.msk.f32.gmra.mxu0 %vm2352_vm8, %v2307_v60  ;;  %2990 = vmatmul.mubr.msk.f32.gmra.mxu1 %vm2352_vm8, %v2323_v8  ;;  %v1052_v0 = vsel %vm5526_vm3, %v3086_v16, 0.0  ;;  %vm5538_vm3 = vmmov %vm5530_vm2 }
 0x1b1   : > { %v1665_v61 = vpop.permute.xlu1 %1664  ;;  %v1633_v28 = vpop.permute.xlu0 %1632 }
 0x1b2   : > { %v2226_v36 = vsel %vm2204_vm4, %v2193_v26, %v1665_v61  ;;  %v2210_v41 = vsel %vm2204_vm4, %v2177_v57, %v1633_v28 }
 0x1b3   : > { %1804 = vrot.lane.b32.xlu1 %v5431_v47, %s3111_s5  ;;  %1772 = vrot.lane.b32.xlu0 %v3076_v17, %s3111_s5 }
 0x1b5   : > { %v1791_v33 = vpop.permute.xlu1 %1790  ;;  %v1759_v3 = vpop.permute.xlu0 %1758 }
 0x1b6   : > { %v2242_v18 = vsel %vm2237_vm9, %v2209_v42, %v1759_v3  ;;  %v2258_v45 = vsel %vm2237_vm9, %v2225_v20, %v1791_v33  ;;  %v3087_v33 = vld [vmem:[%s3156_s21 + $0x108] sm:$0xff] }
 0x1b7   : > { %1900 = vrot.lane.b32.xlu1 %v3077_v25, %s3112_s12  ;;  %1868 = vrot.lane.b32.xlu0 %v3078_v27, %s3112_s12  ;;  %v3088_v3 = vld [vmem:[%s3156_s21 + $0x88] sm:$0xff] }
 0x1b9   : > { %v1793_v46 = vpop.permute.xlu1 %1792  ;;  %v1761_v37 = vpop.permute.xlu0 %1760 }
 0x1ba   : > { %v2259_v12 = vsel %vm2237_vm9, %v2226_v36, %v1793_v46  ;;  %v2243_v23 = vsel %vm2237_vm9, %v2210_v41, %v1761_v37  ;;  %v3089_v37 = vld [vmem:[%s3156_s21 + $0x81] sm:$0xff] }
 0x1bb   : > { %1870 = vrot.lane.b32.xlu1 %v3079_v13, %s3112_s12  ;;  %1550 = vrot.lane.b32.xlu0 %v3077_v25, %s3109_s25  ;;  %v1002_v25 = vld [vmem:[%s3156_s21 + $0x101] sm:$0xff] }
 0x1bc   : > { %v5534_v36 = vld [vmem:[#allocation27_spill] sm:$0xff] }
 0x1bd   : > { %v1889_v47 = vpop.permute.xlu1 %1888  ;;  %v1857_v43 = vpop.permute.xlu0 %1856 }
 0x1be   : > { %v2275_v6 = vsel %vm5518_vm6, %v2242_v18, %v1857_v43  ;;  %v2291_v1 = vsel %vm5520_vm14, %v2258_v45, %v1889_v47  ;;  %vm5529_vm6 = vmmov %vm5517_vm0  ;;  %v1003_v43 = vld [vmem:[%s3156_s21 + $0x109] sm:$0xff]  ;;  %v2178_v18 = vsel %vm2171_vm1, %v4028_v31, %v4315_v2 }
 0x1bf   : > { %1996 = vrot.lane.b32.xlu1 %v3080_v24, %s3113_s20  ;;  %1902 = vrot.lane.b32.xlu0 %v3081_v49, %s3112_s12  ;;  %vm5532_vm14 = vmmov %vm5530_vm2 }
 0x1c1   : > { %v1859_v55 = vpop.permute.xlu1 %1858  ;;  %v4620_v29 = vpop.permute.xlu0 %1538 }
 0x1c2   : > { %v2276_v62 = vsel %vm5527_vm13, %v2243_v23, %v1859_v55  ;;  %v3090_v55 = vld [vmem:[%s3156_s21 + $0x89] sm:$0xff]  ;;  %v2194_v45 = vsel %vm2171_vm1, %v4188_v48, %v4620_v29  ;;  %vm5539_vm13 = vmmov %vm5530_vm2 }
 0x1c3   : > { %1552 = vrot.lane.b32.xlu1 %v3081_v49, %s3109_s25  ;;  %2028 = vrot.lane.b32.xlu0 %v3082_v38, %s3113_s20 }
 0x1c5   : > { %v1985_v4 = vpop.permute.xlu1 %1984  ;;  %v1891_v15 = vpop.permute.xlu0 %1890 }
 0x1c6   : > { %v2308_v22 = vsel %vm5519_vm7, %v2275_v6, %v1985_v4  ;;  %v2292_v8 = vsel %vm5528_vm11, %v2259_v12, %v1891_v15  ;;  %v3091_v4 = vld [vmem:[%s3156_s21 + $0x82] sm:$0xff]  ;;  %vm5531_vm7 = vmmov %vm5517_vm0 }
 0x1c7   : > { %1678 = vrot.lane.b32.xlu1 %v3082_v38, %s3110_s26  ;;  %1646 = vrot.lane.b32.xlu0 %v3080_v24, %s3110_s26  ;;  %vm5540_vm11 = vmmov %vm5517_vm0 }
 0x1c8   : > { %2968 = vmatprep.mubr.msk.f32.mxu0 %vm2352_vm8, %v2308_v22 }
 0x1c9   : > { %v4647_v10 = vpop.permute.xlu1 %1540  ;;  %v2017_v9 = vpop.permute.xlu0 %2016 }
 0x1ca   : > { %v2324_v44 = vsel %vm5521_vm15, %v2291_v1, %v2017_v9  ;;  %v1005_v1 = vld [vmem:[%s3156_s21 + $0x10a] sm:$0xff]  ;;  %vm5533_vm15 = vmmov %vm5517_vm0 }
 0x1cb   : > { %2030 = vrot.lane.b32.xlu1 %v1103_v54, %s3113_s20  ;;  %1998 = vrot.lane.b32.xlu0 %v1087_v56, %s3113_s20  ;;  %v1105_v29 = vsel %vm5523_vm12, %v1005_v1, 0.0  ;;  %v3092_v9 = vld [vmem:[%s3156_s21 + $0x8a] sm:$0xff]  ;;  %vm5535_vm12 = vnez %v5534_v36 }
 0x1cc   : > { %2992 = vmatprep.mubr.msk.f32.mxu1 %vm2352_vm8, %v2324_v44  ;;  %v1089_v44 = vsel %vm5525_vm5, %v3092_v9, 0.0 }
 0x1cd   : > { %v1667_v59 = vpop.permute.xlu1 %1666  ;;  %v1635_v21 = vpop.permute.xlu0 %1634 }
 0x1ce   : > { %v2211_v6 = vsel %vm2204_vm4, %v2178_v18, %v1635_v21  ;;  %v2227_v2 = vsel %vm2204_vm4, %v2194_v45, %v1667_v59  ;;  %v2179_v59 = vsel %vm2171_vm1, %v4025_v5, %v4313_v30  ;;  %v2195_v21 = vsel %vm2171_vm1, %v4185_v52, %v4647_v10  ;;  %v5536_v30 = vld [vmem:[#allocation12_spill] sm:$0xff]  ;;  %v3096_v18 = vld [vmem:[%s3156_s21 + $0x92] sm:$0xff] }
 0x1cf   : > { %1680 = vrot.lane.b32.xlu1 %v1035_v14, %s3110_s26  ;;  %1648 = vrot.lane.b32.xlu0 %v1019_v50, %s3110_s26  ;;  %v1037_v5 = vsel %vm5535_vm12, %v1005_v1, 0.0  ;;  %vm5537_vm5 = vnez %v5536_v30 }
 0x1d0   : > { %v1021_v41 = vsel %vm5537_vm5, %v3092_v9, 0.0 }
 0x1d1   : > { %v2019_v60 = vpop.permute.xlu1 %2018  ;;  %v1987_v61 = vpop.permute.xlu0 %1986 }
 0x1d2   : > { %v2325_v28 = vsel %vm5517_vm0, %v2292_v8, %v2019_v60  ;;  %v2309_v17 = vsel %vm5529_vm6, %v2276_v62, %v1987_v61  ;;  %v3093_v62 = vld [vmem:[%s3156_s21 + $0x90] sm:$0xff] }
 0x1d3   : > { %1806 = vrot.lane.b32.xlu1 %v1068_v58, %s3111_s5  ;;  %1774 = vrot.lane.b32.xlu0 %v1052_v0, %s3111_s5  ;;  %v1070_v0 = vsel %vm3816_vm10, %v1038_v40, 0.0  ;;  %v5541_v8 = vld [vmem:[#allocation45_spill] sm:$0xff]  ;;  %vm5545_vm10 = vmmov %vm5530_vm2 }
 0x1d4   : > { %2969 = vmatmul.mubr.msk.f32.gmra.mxu0 %vm2352_vm8, %v2309_v17  ;;  %2993 = vmatmul.mubr.msk.f32.gmra.mxu1 %vm2352_vm8, %v2325_v28  ;;  %vm5542_vm6 = vnez %v5541_v8  ;;  %v1039_v17 = vld [vmem:[%s3156_s21 + $0x118] sm:$0xff] }
 0x1d5   : > { %v1669_v35 = vpop.permute.xlu1 %1668  ;;  %v1637_v53 = vpop.permute.xlu0 %1636  ;;  %v1054_v60 = vsel %vm5542_vm6, %v3093_v62, 0.0 }
 0x1d6   : > { %v2228_v57 = vsel %vm2204_vm4, %v2195_v21, %v1669_v35  ;;  %v2212_v11 = vsel %vm2204_vm4, %v2179_v59, %v1637_v53  ;;  %v5552_v21 = vld [vmem:[#allocation31_spill] sm:$0xff] }
 0x1d7   : > { %1808 = vrot.lane.b32.xlu1 %v3087_v33, %s3111_s5  ;;  %1776 = vrot.lane.b32.xlu0 %v3088_v3, %s3111_s5 }
 0x1d9   : > { %v1795_v27 = vpop.permute.xlu1 %1794  ;;  %v1763_v46 = vpop.permute.xlu0 %1762 }
 0x1da   : > { %v2244_v15 = vsel %vm2237_vm9, %v2211_v6, %v1763_v46  ;;  %v2260_v39 = vsel %vm2237_vm9, %v2227_v2, %v1795_v27  ;;  %v1073_v27 = vld [vmem:[%s3156_s21 + $0x119] sm:$0xff] }
 0x1db   : > { %1904 = vrot.lane.b32.xlu1 %v1002_v25, %s3112_s12  ;;  %1872 = vrot.lane.b32.xlu0 %v3089_v37, %s3112_s12 }
 0x1dd   : > { %v1797_v13 = vpop.permute.xlu1 %1796  ;;  %v1765_v47 = vpop.permute.xlu0 %1764 }
 0x1de   : > { %v2261_v51 = vsel %vm2237_vm9, %v2228_v57, %v1797_v13  ;;  %v2245_v26 = vsel %vm2237_vm9, %v2212_v11, %v1765_v47  ;;  %v3095_v13 = vld [vmem:[%s3156_s21 + $0x99] sm:$0xff] }
 0x1df   : > { %1554 = vrot.lane.b32.xlu1 %v1002_v25, %s3109_s25  ;;  %1522 = vrot.lane.b32.xlu0 %v3089_v37, %s3109_s25  ;;  %v3094_v25 = vld [vmem:[%s3156_s21 + $0x91] sm:$0xff] }
 0x1e1   : > { %v1893_v24 = vpop.permute.xlu1 %1892  ;;  %v1861_v49 = vpop.permute.xlu0 %1860 }
 0x1e2   : > { %v2277_v63 = vsel %vm5530_vm2, %v2244_v15, %v1861_v49  ;;  %v2293_v54 = vsel %vm5532_vm14, %v2260_v39, %v1893_v24  ;;  %v1075_v24 = vld [vmem:[%s3156_s21 + $0x11a] sm:$0xff]  ;;  %vm5547_vm2 = vmmov %vm5517_vm0 }
 0x1e3   : > { %1906 = vrot.lane.b32.xlu1 %v1003_v43, %s3112_s12  ;;  %1874 = vrot.lane.b32.xlu0 %v3090_v55, %s3112_s12  ;;  %v5543_v49 = vld [vmem:[#allocation34_spill] sm:$0xff]  ;;  %vm5549_vm14 = vmmov %vm5517_vm0 }
 0x1e4   : > { %v3097_v15 = vld [vmem:[%s3156_s21 + $0x9a] sm:$0xff]  ;;  %vm5563_vm6 = vmmov %vm5547_vm2 }
 0x1e5   : > { %v1863_v42 = vpop.permute.xlu1 %1862  ;;  %v4698_v38 = vpop.permute.xlu0 %1542 }
 0x1e6   : > { %v2278_v52 = vsel %vm5538_vm3, %v2245_v26, %v1863_v42 }
 0x1e7   : > { %2032 = vrot.lane.b32.xlu1 %v1004_v19, %s3113_s20  ;;  %2000 = vrot.lane.b32.xlu0 %v3091_v4, %s3113_s20 }
 0x1e9   : > { %v1989_v22 = vpop.permute.xlu1 %1988  ;;  %v1895_v20 = vpop.permute.xlu0 %1894 }
 0x1ea   : > { %v2310_v31 = vsel %vm5531_vm7, %v2277_v63, %v1989_v22  ;;  %v2294_v10 = vsel %vm5539_vm13, %v2261_v51, %v1895_v20  ;;  %v1091_v63 = vsel %vm5537_vm5, %v3097_v15, 0.0  ;;  %vm5548_vm7 = vmmov %vm5538_vm3 }
 0x1eb   : > { %1556 = vrot.lane.b32.xlu1 %v1003_v43, %s3109_s25  ;;  %1524 = vrot.lane.b32.xlu0 %v3090_v55, %s3109_s25  ;;  %v5544_v55 = vld [vmem:[#allocation88_spill] sm:$0xff]  ;;  %vm5555_vm5 = vmmov %vm5517_vm0 }
 0x1ec   : > { %2971 = vmatprep.mubr.msk.f32.mxu0 %vm2352_vm8, %v2310_v31  ;;  %v5546_v31 = vld [vmem:[#allocation39_spill] sm:$0xff]  ;;  %vm5559_vm13 = vmmov %vm5548_vm7 }
 0x1ed   : > { %v4719_v34 = vpop.permute.xlu1 %1544  ;;  %v2021_v56 = vpop.permute.xlu0 %2020  ;;  %v2196_v2 = vsel %vm2171_vm1, %v5546_v31, %v4698_v38 }
 0x1ee   : > { %v2326_v48 = vsel %vm5533_vm15, %v2293_v54, %v2021_v56  ;;  %v2197_v57 = vsel %vm2171_vm1, %v5552_v21, %v4719_v34  ;;  %vm5553_vm15 = vmmov %vm5538_vm3 }
 0x1ef   : > { %1682 = vrot.lane.b32.xlu1 %v1004_v19, %s3110_s26  ;;  %1650 = vrot.lane.b32.xlu0 %v3091_v4, %s3110_s26  ;;  %v2180_v19 = vsel %vm2171_vm1, %v5544_v55, %v5543_v49  ;;  %v1107_v4 = vsel %vm5535_vm12, %v1075_v24, 0.0  ;;  %vm5554_vm12 = vmmov %vm5538_vm3 }
 0x1f0   : > { %2995 = vmatprep.mubr.msk.f32.mxu1 %vm2352_vm8, %v2326_v48  ;;  %vm5556_vm3 = vmmov %vm5517_vm0 }
 0x1f1   : > { %v4731_v14 = vpop.permute.xlu1 %1670  ;;  %v1639_v50 = vpop.permute.xlu0 %1638 }
 0x1f2   : > { %v2213_v42 = vsel %vm2204_vm4, %v2180_v19, %v1639_v50  ;;  %v2229_v54 = vsel %vm2204_vm4, %v2196_v2, %v4731_v14  ;;  %v5550_v50 = vld [vmem:[#allocation44_spill] sm:$0xff]  ;;  %v5551_v14 = vld [vmem:[#allocation87_spill] sm:$0xff] }
 0x1f3   : > { %2034 = vrot.lane.b32.xlu1 %v1105_v29, %s3113_s20  ;;  %2002 = vrot.lane.b32.xlu0 %v1089_v44, %s3113_s20  ;;  %v2181_v59 = vsel %vm2171_vm1, %v5551_v14, %v5550_v50  ;;  %v4859_v14 = vld [vmem:[%s5074_s2] ss:$0 sm:$0xff] }
 0x1f5   : > { %v2023_v12 = vpop.permute.xlu1 %2022  ;;  %v1991_v23 = vpop.permute.xlu0 %1990 }
 0x1f6   : > { %v2327_v58 = vsel %vm5540_vm11, %v2294_v10, %v2023_v12  ;;  %v2311_v16 = vsel %vm5517_vm0, %v2278_v52, %v1991_v23  ;;  %vm5561_vm11 = vmmov %vm5517_vm0 }
 0x1f7   : > { %1684 = vrot.lane.b32.xlu1 %v1037_v5, %s3110_s26  ;;  %1652 = vrot.lane.b32.xlu0 %v1021_v41, %s3110_s26  ;;  %vm5562_vm0 = vmmov %vm5548_vm7  ;;  %s2902_s26 = sshll.u32 %s5622_s18, 8 }
 0x1f8   : > { %2972 = vmatmul.mubr.msk.f32.gmra.mxu0 %vm2352_vm8, %v2311_v16  ;;  %2996 = vmatmul.mubr.msk.f32.gmra.mxu1 %vm2352_vm8, %v2327_v58  ;;  %s4869_s29 = scalar_lea.vmem %s5076_s4, %s2902_s26 }
 0x1f9   : > { %v1673_v61 = vpop.permute.xlu1 %1672  ;;  %v1641_v28 = vpop.permute.xlu0 %1640 }
 0x1fa   : > { %v2230_v11 = vsel %vm2204_vm4, %v2197_v57, %v1673_v61  ;;  %v2214_v51 = vsel %vm2204_vm4, %v2181_v59, %v1641_v28  ;;  %v5557_v28 = vld [vmem:[#allocation3_spill] sm:$0xff] }
 0x1fb   : > { %1810 = vrot.lane.b32.xlu1 %v1070_v0, %s3111_s5  ;;  %1778 = vrot.lane.b32.xlu0 %v1054_v60, %s3111_s5 }
 0x1fd   : > { %v1799_v35 = vpop.permute.xlu1 %1798  ;;  %v1767_v53 = vpop.permute.xlu0 %1766 }
 0x1fe   : > { %v2246_v6 = vsel %vm2237_vm9, %v2213_v42, %v1767_v53  ;;  %v2262_v56 = vsel %vm2237_vm9, %v2229_v54, %v1799_v35 }
 0x1ff   : > { %1812 = vrot.lane.b32.xlu1 %v1039_v17, %s3111_s5  ;;  %1780 = vrot.lane.b32.xlu0 %v4557_v32, %s3111_s5  ;;  %v1074_v32 = vld [vmem:[%s3156_s21 + $0x112] sm:$0xff]  ;;  %s2674_s21 = sld [smem:[#allocation2]] }
 0x200   : > { %v5558_v17 = vld [vmem:[#allocation30_spill] sm:$0xff] }
 0x201   : > { %v1801_v33 = vpop.permute.xlu1 %1800  ;;  %v1769_v3 = vpop.permute.xlu0 %1768  ;;  %v2182_v35 = vsel %vm2171_vm1, %v5558_v17, %v5557_v28  ;;  %v5575_v17 = vld [vmem:[#allocation47_spill] sm:$0xff] }
 0x202   : > { %v2263_v26 = vsel %vm2237_vm9, %v2230_v11, %v1801_v33  ;;  %v2247_v36 = vsel %vm2237_vm9, %v2214_v51, %v1769_v3 }
 0x203   : > { %1908 = vrot.lane.b32.xlu1 %v1072_v7, %s3112_s12  ;;  %1876 = vrot.lane.b32.xlu0 %v3094_v25, %s3112_s12 }
 0x205   : > { %v1897_v46 = vpop.permute.xlu1 %1896  ;;  %v1865_v37 = vpop.permute.xlu0 %1864  ;;  %v4862_v21 = vstv %s2674_s21 }
 0x206   : > { %v2279_v22 = vsel %vm5545_vm10, %v2246_v6, %v1865_v37  ;;  %v2295_v1 = vsel %vm5548_vm7, %v2262_v56, %v1897_v46  ;;  %vm5567_vm10 = vmmov %vm5562_vm0 }
 0x207   : > { %1910 = vrot.lane.b32.xlu1 %v1073_v27, %s3112_s12  ;;  %1878 = vrot.lane.b32.xlu0 %v3095_v13, %s3112_s12  ;;  %v5560_v27 = vld [vmem:[#allocation58_spill] sm:$0xff]  ;;  %vm5569_vm7 = vmmov %vm5556_vm3 }
 0x209   : > { %v1867_v47 = vpop.permute.xlu1 %1866  ;;  %v1547_v43 = vpop.permute.xlu0 %1546 }
 0x20a   : > { %v2280_v5 = vsel %vm5553_vm15, %v2247_v36, %v1867_v47  ;;  %v2198_v46 = vsel %vm2171_vm1, %v5560_v27, %v1547_v43  ;;  %v5564_v43 = vld [vmem:[#allocation61_spill] sm:$0xff] }
 0x20b   : > { %2036 = vrot.lane.b32.xlu1 %v1074_v32, %s3113_s20  ;;  %2004 = vrot.lane.b32.xlu0 %v3096_v18, %s3113_s20  ;;  %v5565_v18 = vld [vmem:[#allocation35_spill] sm:$0xff] }
 0x20c   : > { %v2183_v6 = vsel %vm2171_vm1, %v5565_v18, %v5564_v43  ;;  %v5580_v18 = vld [vmem:[#allocation57_spill] sm:$0xff] }
 0x20d   : > { %v1993_v20 = vpop.permute.xlu1 %1992  ;;  %v1899_v45 = vpop.permute.xlu0 %1898 }
 0x20e   : > { %v2312_v39 = vsel %vm5547_vm2, %v2279_v22, %v1993_v20  ;;  %v2296_v30 = vsel %vm5554_vm12, %v2263_v26, %v1899_v45  ;;  %vm5568_vm2 = vmmov %vm5562_vm0 }
 0x20f   : > { %2038 = vrot.lane.b32.xlu1 %v1107_v4, %s3113_s20  ;;  %2006 = vrot.lane.b32.xlu0 %v1091_v63, %s3113_s20  ;;  %v5566_v4 = vld [vmem:[#allocation32_spill] sm:$0xff] }
 0x210   : > { %2974 = vmatprep.mubr.msk.f32.mxu0 %vm2352_vm8, %v2312_v39 }
 0x211   : > { %v1549_v48 = vpop.permute.xlu1 %1548  ;;  %v2025_v29 = vpop.permute.xlu0 %2024 }
 0x212   : > { %v2328_v9 = vsel %vm5549_vm14, %v2295_v1, %v2025_v29  ;;  %v2199_v15 = vsel %vm2171_vm1, %v5566_v4, %v1549_v48  ;;  %vm5570_vm14 = vmmov %vm5556_vm3 }
 0x213   : > { %2998 = vmatprep.mubr.msk.f32.mxu1 %vm2352_vm8, %v2328_v9 }
 0x215   : > { %v1675_v38 = vpop.permute.xlu1 %1674  ;;  %v1643_v44 = vpop.permute.xlu0 %1642 }
 0x216   : > { %v2215_v53 = vsel %vm2204_vm4, %v2182_v35, %v1643_v44  ;;  %v2231_v13 = vsel %vm2204_vm4, %v2198_v46, %v1675_v38  ;;  %v5576_v35 = vld [vmem:[#allocation4_spill] sm:$0xff] }
 0x219   : > { %v2027_v41 = vpop.permute.xlu1 %2026  ;;  %v1995_v52 = vpop.permute.xlu0 %1994 }
 0x21a   : > { %v2329_v10 = vsel %vm5555_vm5, %v2296_v30, %v2027_v41  ;;  %v2313_v12 = vsel %vm5556_vm3, %v2280_v5, %v1995_v52  ;;  %vm5571_vm5 = vcmask 130048  }
 0x21b   : > { %2975 = vmatmul.mubr.msk.f32.gmra.mxu0 %vm2352_vm8, %v2313_v12  ;;  %2999 = vmatmul.mubr.msk.f32.gmra.mxu1 %vm2352_vm8, %v2329_v10  ;;  %vm5572_vm3 = vmmov %vm5571_vm5 }
 0x21d   : > { %v1677_v34 = vpop.permute.xlu1 %1676  ;;  %v1645_v23 = vpop.permute.xlu0 %1644 }
 0x21e   : > { %v2232_v63 = vsel %vm2204_vm4, %v2199_v15, %v1677_v34  ;;  %v2216_v22 = vsel %vm2204_vm4, %v2183_v6, %v1645_v23  ;;  %v5581_v6 = vld [vmem:[#allocation13_spill] sm:$0xff]  ;;  %v5582_v15 = vld [vmem:[#allocation54_spill] sm:$0xff] }
 0x21f   : > { %v2185_v4 = vsel %vm2171_vm1, %v5581_v6, %v5580_v18 }
 0x221   : > { %v1803_v40 = vpop.permute.xlu1 %1802  ;;  %v1771_v58 = vpop.permute.xlu0 %1770 }
 0x222   : > { %v2248_v7 = vsel %vm2237_vm9, %v2215_v53, %v1771_v58  ;;  %v2264_v32 = vsel %vm2237_vm9, %v2231_v13, %v1803_v40  ;;  %v2184_v53 = vsel %vm2171_vm1, %v5576_v35, %v5575_v17  ;;  %v5590_v17 = vld [vmem:[#allocation33_spill] sm:$0xff] }
 0x225   : > { %v1805_v16 = vpop.permute.xlu1 %1804  ;;  %v1773_v0 = vpop.permute.xlu0 %1772 }
 0x226   : > { %v2265_v20 = vsel %vm2237_vm9, %v2232_v63, %v1805_v16  ;;  %v2249_v45 = vsel %vm2237_vm9, %v2216_v22, %v1773_v0 }
 0x229   : > { %v1901_v62 = vpop.permute.xlu1 %1900  ;;  %v1869_v8 = vpop.permute.xlu0 %1868 }
 0x22a   : > { %v2281_v33 = vsel %vm5559_vm13, %v2248_v7, %v1869_v8  ;;  %v2297_v47 = vsel %vm5562_vm0, %v2264_v32, %v1901_v62  ;;  %vm5573_vm0 = vmmov %vm5572_vm3  ;;  %v5577_v7 = vld [vmem:[#allocation29_spill] sm:$0xff] }
 0x22d   : > { %v1871_v60 = vpop.permute.xlu1 %1870  ;;  %v4822_v61 = vpop.permute.xlu0 %1550 }
 0x22e   : > { %v2282_v31 = vsel %vm5567_vm10, %v2249_v45, %v1871_v60  ;;  %vm5578_vm10 = vmmov %vm5568_vm2 }
 0x231   : > { %v1997_v3 = vpop.permute.xlu1 %1996  ;;  %v1903_v25 = vpop.permute.xlu0 %1902 }
 0x232   : > { %v2314_v37 = vsel %vm5561_vm11, %v2281_v33, %v1997_v3  ;;  %v2298_v2 = vsel %vm5568_vm2, %v2265_v20, %v1903_v25  ;;  %v2200_v33 = vsel %vm2171_vm1, %v5577_v7, %v4822_v61 }
 0x233   : > { %2977 = vmatprep.mubr.msk.f32.mxu0 %vm2352_vm8, %v2314_v37 }
 0x235   : > { %v4837_v24 = vpop.permute.xlu1 %1552  ;;  %v2029_v49 = vpop.permute.xlu0 %2028 }
 0x236   : > { %v2330_v55 = vsel %vm5563_vm6, %v2297_v47, %v2029_v49  ;;  %vm5574_vm6 = vmmov %vm5573_vm0  ;;  %v2201_v63 = vsel %vm2171_vm1, %v5582_v15, %v4837_v24 }
 0x237   : > { %3001 = vmatprep.mubr.msk.f32.mxu1 %vm2352_vm8, %v2330_v55 }
 0x239   : > { %v1679_v19 = vpop.permute.xlu1 %1678  ;;  %v1647_v42 = vpop.permute.xlu0 %1646 }
 0x23a   : > { %v2233_v3 = vsel %vm2204_vm4, %v2200_v33, %v1679_v19  ;;  %v2217_v25 = vsel %vm2204_vm4, %v2184_v53, %v1647_v42  ;;  %v5591_v53 = vld [vmem:[#allocation40_spill] sm:$0xff] }
 0x23d   : > { %v2031_v39 = vpop.permute.xlu1 %2030  ;;  %v1999_v54 = vpop.permute.xlu0 %1998 }
 0x23e   : > { %v2331_v56 = vsel %vm5569_vm7, %v2298_v2, %v2031_v39  ;;  %v2315_v1 = vsel %vm5570_vm14, %v2282_v31, %v1999_v54  ;;  %vm5579_vm14 = vmmov %vm5569_vm7 }
 0x23f   : > { %2978 = vmatmul.mubr.msk.f32.gmra.mxu0 %vm2352_vm8, %v2315_v1  ;;  %3002 = vmatmul.mubr.msk.f32.gmra.mxu1 %vm2352_vm8, %v2331_v56 }
 0x241   : > { %v1681_v48 = vpop.permute.xlu1 %1680  ;;  %v1649_v29 = vpop.permute.xlu0 %1648 }
 0x242   : > { %v2234_v22 = vsel %vm2204_vm4, %v2201_v63, %v1681_v48  ;;  %v2218_v20 = vsel %vm2204_vm4, %v2185_v4, %v1649_v29 }
 0x245   : > { %v1807_v9 = vpop.permute.xlu1 %1806  ;;  %v1775_v38 = vpop.permute.xlu0 %1774 }
 0x246   : > { %v2266_v27 = vsel %vm2237_vm9, %v2233_v3, %v1807_v9  ;;  %v2250_v46 = vsel %vm2237_vm9, %v2217_v25, %v1775_v38 }
 0x249   : > { %v1809_v44 = vpop.permute.xlu1 %1808  ;;  %v1777_v50 = vpop.permute.xlu0 %1776 }
 0x24a   : > { %v2267_v45 = vsel %vm2237_vm9, %v2234_v22, %v1809_v44  ;;  %v2251_v31 = vsel %vm2237_vm9, %v2218_v20, %v1777_v50 }
 0x24c   : > { %v2964_v59 = vpop.f32.mrf.mxu0  ;;  %v2988_v57 = vpop.f32.mrf.mxu1 }
 0x24d   : > { %v2521_v11 = vadd.f32 %v2964_v59, %v4859_v14  ;;  %v2601_v51 = vadd.f32 %v2988_v57, %v4859_v14  ;;  %v1905_v26 = vpop.permute.xlu1 %1904  ;;  %v1873_v36 = vpop.permute.xlu0 %1872 }
 0x24e   : > { %v2595_v5 = vpop.f32.mrf.mxu1  ;;  %v2515_v30 = vpop.f32.mrf.mxu0  ;;  %v2299_v37 = vsel %vm5578_vm10, %v2266_v27, %v1905_v26  ;;  %v2283_v13 = vsel %vm5568_vm2, %v2250_v46, %v1873_v36 }
 0x24f   : > { %vm2676_vm15 = vcmp.ge.f32.partialorder %v2521_v11, 0.0  ;;  %v2709_v41 = vmul.f32 %v4862_v21, %v2521_v11  ;;  %vm2692_vm12 = vcmp.ge.f32.partialorder %v2601_v51, 0.0  ;;  %v2725_v52 = vmul.f32 %v4862_v21, %v2601_v51 }
 0x250   : > { %v2596_v10 = vadd.f32 %v4859_v14, %v2595_v5  ;;  %v2516_v12 = vadd.f32 %v4859_v14, %v2515_v30 }
 0x251   : > { %v2741_v34 = vsel %vm2676_vm15, %v2521_v11, %v2709_v41  ;;  %v2757_v23 = vsel %vm2692_vm12, %v2601_v51, %v2725_v52  ;;  %v4875_v40 = vpop.permute.xlu1 %1554  ;;  %v4877_v58 = vpop.permute.xlu0 %1522  ;;  %vm5583_vm15 = vmmov %vm5568_vm2 }
 0x252   : > { %2773 = vst.msk [vmem:[%s4869_s29 + $0x8] sm:$0xff] %vm5571_vm5, %v2741_v34  ;;  %vm2691_vm13 = vcmp.ge.f32.partialorder %v2596_v10, 0.0  ;;  %v2724_v16 = vmul.f32 %v4862_v21, %v2596_v10  ;;  %vm2675_vm11 = vcmp.ge.f32.partialorder %v2516_v12, 0.0  ;;  %v2708_v0 = vmul.f32 %v4862_v21, %v2516_v12  ;;  %vm5584_vm12 = vmmov %vm5568_vm2 }
 0x253   : > { %2789 = vst.msk [vmem:[%s4869_s29 + $0x88] sm:$0xff] %vm5572_vm3, %v2757_v23  ;;  %vm5585_vm5 = vmmov %vm5569_vm7  ;;  %v2202_v35 = vsel %vm2171_vm1, %v5590_v17, %v4875_v40  ;;  %v2186_v7 = vsel %vm2171_vm1, %v5591_v53, %v4877_v58  ;;  %v5593_v40 = vld [vmem:[#allocation41_spill] sm:$0xff]  ;;  %v5594_v58 = vld [vmem:[#allocation36_spill] sm:$0xff] }
 0x254   : > { %v2756_v62 = vsel %vm2691_vm13, %v2596_v10, %v2724_v16  ;;  %v2740_v8 = vsel %vm2675_vm11, %v2516_v12, %v2708_v0  ;;  %vm5586_vm3 = vmmov %vm5585_vm5 }
 0x255   : > { %2788 = vst.msk [vmem:[%s4869_s29 + $0x80] sm:$0xff] %vm5573_vm0, %v2756_v62  ;;  %v1907_v60 = vpop.permute.xlu1 %1906  ;;  %v1875_v28 = vpop.permute.xlu0 %1874 }
 0x256   : > { %2772 = vst.msk [vmem:[%s4869_s29] sm:$0xff] %vm5574_vm6, %v2740_v8  ;;  %v2300_v2 = vsel %vm5583_vm15, %v2267_v45, %v1907_v60  ;;  %v2284_v39 = vsel %vm5584_vm12, %v2251_v31, %v1875_v28  ;;  %vm5587_vm6 = vmmov %vm5573_vm0 }
 0x257   : > { %vm5592_vm15 = vmmov %vm5584_vm12 }
 0x259   : > { %v2033_v32 = vpop.permute.xlu1 %2032  ;;  %v2001_v47 = vpop.permute.xlu0 %2000 }
 0x25a   : > { %v2332_v49 = vsel %vm5569_vm7, %v2299_v37, %v2033_v32  ;;  %v2316_v55 = vsel %vm5579_vm14, %v2283_v13, %v2001_v47  ;;  %vm5588_vm7 = vmmov %vm5573_vm0 }
 0x25b   : > { %2980 = vmatprep.mubr.msk.f32.mxu0 %vm2352_vm8, %v2316_v55  ;;  %3004 = vmatprep.mubr.msk.f32.mxu1 %vm2352_vm8, %v2332_v49  ;;  %vm5589_vm14 = vmmov %vm5573_vm0 }
 0x25d   : > { %v4905_v61 = vpop.permute.xlu1 %1556  ;;  %v4907_v19 = vpop.permute.xlu0 %1524 }
 0x25e   : > { %v2203_v47 = vsel %vm2171_vm1, %v5593_v40, %v4905_v61  ;;  %v2187_v49 = vsel %vm2171_vm1, %v5594_v58, %v4907_v19  ;;  %vm5598_vm1 = vmmov %vm5586_vm3 }
 0x261   : > { %v1683_v42 = vpop.permute.xlu1 %1682  ;;  %v1651_v43 = vpop.permute.xlu0 %1650 }
 0x262   : > { %v2235_v33 = vsel %vm2204_vm4, %v2202_v35, %v1683_v42  ;;  %v2219_v3 = vsel %vm2204_vm4, %v2186_v7, %v1651_v43 }
 0x265   : > { %v2035_v54 = vpop.permute.xlu1 %2034  ;;  %v2003_v56 = vpop.permute.xlu0 %2002 }
 0x266   : > { %v2333_v1 = vsel %vm5585_vm5, %v2300_v2, %v2035_v54  ;;  %v2317_v9 = vsel %vm5586_vm3, %v2284_v39, %v2003_v56  ;;  %vm5595_vm5 = vmmov %vm5586_vm3 }
 0x267   : > { %2981 = vmatmul.mubr.msk.f32.gmra.mxu0 %vm2352_vm8, %v2317_v9  ;;  %3005 = vmatmul.mubr.msk.f32.gmra.mxu1 %vm2352_vm8, %v2333_v1 }
 0x269   : > { %v1685_v24 = vpop.permute.xlu1 %1684  ;;  %v1653_v48 = vpop.permute.xlu0 %1652 }
 0x26a   : > { %v2236_v43 = vsel %vm2204_vm4, %v2203_v47, %v1685_v24  ;;  %v2220_v18 = vsel %vm2204_vm4, %v2187_v49, %v1653_v48 }
 0x26d   : > { %v1811_v29 = vpop.permute.xlu1 %1810  ;;  %v1779_v38 = vpop.permute.xlu0 %1778 }
 0x26e   : > { %v2268_v25 = vsel %vm2237_vm9, %v2235_v33, %v1811_v29  ;;  %v2252_v27 = vsel %vm2237_vm9, %v2219_v3, %v1779_v38 }
 0x270   : > { %v2967_v44 = vpop.f32.mrf.mxu0  ;;  %v2991_v50 = vpop.f32.mrf.mxu1 }
 0x271   : > { %v2531_v59 = vadd.f32 %v2967_v44, %v4859_v14  ;;  %v2611_v57 = vadd.f32 %v2991_v50, %v4859_v14  ;;  %v1813_v11 = vpop.permute.xlu1 %1812  ;;  %v1781_v51 = vpop.permute.xlu0 %1780 }
 0x272   : > { %v2605_v26 = vpop.f32.mrf.mxu1  ;;  %v2525_v36 = vpop.f32.mrf.mxu0  ;;  %v2269_v6 = vsel %vm2237_vm9, %v2236_v43, %v1813_v11  ;;  %v2253_v61 = vsel %vm2237_vm9, %v2220_v18, %v1781_v51 }
 0x273   : > { %vm2678_vm13 = vcmp.ge.f32.partialorder %v2531_v59, 0.0  ;;  %v2711_v5 = vmul.f32 %v4862_v21, %v2531_v59  ;;  %vm2694_vm11 = vcmp.ge.f32.partialorder %v2611_v57, 0.0  ;;  %v2727_v30 = vmul.f32 %v4862_v21, %v2611_v57 }
 0x274   : > { %v2606_v41 = vadd.f32 %v4859_v14, %v2605_v26  ;;  %v2526_v52 = vadd.f32 %v4859_v14, %v2525_v36 }
 0x275   : > { %v2743_v10 = vsel %vm2678_vm13, %v2531_v59, %v2711_v5  ;;  %v2759_v12 = vsel %vm2694_vm11, %v2611_v57, %v2727_v30  ;;  %v1909_v34 = vpop.permute.xlu1 %1908  ;;  %v1877_v23 = vpop.permute.xlu0 %1876  ;;  %vm5596_vm13 = vmmov %vm5584_vm12 }
 0x276   : > { %2775 = vst.msk [vmem:[%s4869_s29 + $0x18] sm:$0xff] %vm5573_vm0, %v2743_v10  ;;  %vm2693_vm10 = vcmp.ge.f32.partialorder %v2606_v41, 0.0  ;;  %v2726_v16 = vmul.f32 %v4862_v21, %v2606_v41  ;;  %vm2677_vm2 = vcmp.ge.f32.partialorder %v2526_v52, 0.0  ;;  %v2710_v0 = vmul.f32 %v4862_v21, %v2526_v52  ;;  %vm5597_vm11 = vmmov %vm5584_vm12 }
 0x277   : > { %2791 = vst.msk [vmem:[%s4869_s29 + $0x98] sm:$0xff] %vm5587_vm6, %v2759_v12  ;;  %v2301_v46 = vsel %vm5592_vm15, %v2268_v25, %v1909_v34  ;;  %v2285_v37 = vsel %vm5584_vm12, %v2252_v27, %v1877_v23  ;;  %vm5599_vm0 = vmmov %vm5598_vm1 }
 0x278   : > { %v2758_v62 = vsel %vm2693_vm10, %v2606_v41, %v2726_v16  ;;  %v2742_v8 = vsel %vm2677_vm2, %v2526_v52, %v2710_v0 }
 0x279   : > { %2790 = vst.msk [vmem:[%s4869_s29 + $0x90] sm:$0xff] %vm5588_vm7, %v2758_v62  ;;  %v1911_v60 = vpop.permute.xlu1 %1910  ;;  %v1879_v28 = vpop.permute.xlu0 %1878  ;;  %vm5601_vm7 = vmmov %vm5587_vm6 }
 0x27a   : > { %2774 = vst.msk [vmem:[%s4869_s29 + $0x10] sm:$0xff] %vm5589_vm14, %v2742_v8  ;;  %v2302_v4 = vsel %vm5596_vm13, %v2269_v6, %v1911_v60  ;;  %v2286_v19 = vsel %vm5597_vm11, %v2253_v61, %v1879_v28  ;;  %vm5602_vm14 = vmmov %vm5587_vm6 }
 0x27d   : > { %v2037_v13 = vpop.permute.xlu1 %2036  ;;  %v2005_v32 = vpop.permute.xlu0 %2004 }
 0x27e   : > { %v2334_v55 = vsel %vm5595_vm5, %v2301_v46, %v2037_v13  ;;  %v2318_v42 = vsel %vm5586_vm3, %v2285_v37, %v2005_v32  ;;  %vm5603_vm5 = vmmov %vm5587_vm6 }
 0x27f   : > { %2983 = vmatprep.mubr.msk.f32.mxu0 %vm2352_vm8, %v2318_v42  ;;  %3007 = vmatprep.mubr.msk.f32.mxu1 %vm2352_vm8, %v2334_v55  ;;  %vm5604_vm3 = vmmov %vm5603_vm5 }
 0x281   : > { %v2039_v15 = vpop.permute.xlu1 %2038  ;;  %v2007_v63 = vpop.permute.xlu0 %2006 }
 0x282   : > { %v2335_v22 = vsel %vm5598_vm1, %v2302_v4, %v2039_v15  ;;  %v2319_v20 = vsel %vm5599_vm0, %v2286_v19, %v2007_v63  ;;  %vm5605_vm1 = vmmov %vm5604_vm3 }
 0x283   : > { %2984 = vmatmul.mubr.msk.f32.gmra.mxu0 %vm2352_vm8, %v2319_v20  ;;  %3008 = vmatmul.mubr.msk.f32.gmra.mxu1 %vm2352_vm8, %v2335_v22  ;;  %vm5600_vm8 = vmmov %vm5587_vm6 }
 0x284   : > { %vm5606_vm0 = vmmov %vm5605_vm1 }
 0x294   : > { %v2970_v45 = vpop.f32.mrf.mxu0  ;;  %v2994_v31 = vpop.f32.mrf.mxu1 }
 0x295   : > { %v2541_v2 = vadd.f32 %v2970_v45, %v4859_v14  ;;  %v2621_v39 = vadd.f32 %v2994_v31, %v4859_v14 }
 0x296   : > { %v2535_v54 = vpop.f32.mrf.mxu0  ;;  %v2615_v56 = vpop.f32.mrf.mxu1 }
 0x297   : > { %vm2680_vm4 = vcmp.ge.f32.partialorder %v2541_v2, 0.0  ;;  %v2713_v1 = vmul.f32 %v4862_v21, %v2541_v2  ;;  %vm2696_vm9 = vcmp.ge.f32.partialorder %v2621_v39, 0.0  ;;  %v2729_v9 = vmul.f32 %v4862_v21, %v2621_v39 }
 0x298   : > { %v2536_v24 = vadd.f32 %v4859_v14, %v2535_v54  ;;  %v2616_v48 = vadd.f32 %v4859_v14, %v2615_v56 }
 0x299   : > { %v2745_v29 = vsel %vm2680_vm4, %v2541_v2, %v2713_v1  ;;  %v2761_v38 = vsel %vm2696_vm9, %v2621_v39, %v2729_v9 }
 0x29a   : > { %2777 = vst.msk [vmem:[%s4869_s29 + $0x28] sm:$0xff] %vm5600_vm8, %v2745_v29  ;;  %vm2679_vm10 = vcmp.ge.f32.partialorder %v2536_v24, 0.0  ;;  %v2712_v44 = vmul.f32 %v4862_v21, %v2536_v24  ;;  %vm2695_vm2 = vcmp.ge.f32.partialorder %v2616_v48, 0.0  ;;  %v2728_v50 = vmul.f32 %v4862_v21, %v2616_v48  ;;  %vm5607_vm8 = vmmov %vm5606_vm0 }
 0x29b   : > { %2793 = vst.msk [vmem:[%s4869_s29 + $0xa8] sm:$0xff] %vm5587_vm6, %v2761_v38  ;;  %vm5608_vm6 = vmmov %vm5606_vm0 }
 0x29c   : > { %v2744_v59 = vsel %vm2679_vm10, %v2536_v24, %v2712_v44  ;;  %v2760_v57 = vsel %vm2695_vm2, %v2616_v48, %v2728_v50 }
 0x29d   : > { %2776 = vst.msk [vmem:[%s4869_s29 + $0x20] sm:$0xff] %vm5601_vm7, %v2744_v59  ;;  %vm5609_vm7 = vmmov %vm5606_vm0 }
 0x29e   : > { %2792 = vst.msk [vmem:[%s4869_s29 + $0xa0] sm:$0xff] %vm5602_vm14, %v2760_v57  ;;  %vm5610_vm14 = vmmov %vm5606_vm0 }
 0x2b8   : > { %v2973_v11 = vpop.f32.mrf.mxu0  ;;  %v2997_v51 = vpop.f32.mrf.mxu1 }
 0x2b9   : > { %v2551_v26 = vadd.f32 %v2973_v11, %v4859_v14  ;;  %v2631_v36 = vadd.f32 %v2997_v51, %v4859_v14 }
 0x2ba   : > { %v2545_v5 = vpop.f32.mrf.mxu0  ;;  %v2625_v30 = vpop.f32.mrf.mxu1 }
 0x2bb   : > { %vm2682_vm15 = vcmp.ge.f32.partialorder %v2551_v26, 0.0  ;;  %v2715_v41 = vmul.f32 %v4862_v21, %v2551_v26  ;;  %vm2698_vm12 = vcmp.ge.f32.partialorder %v2631_v36, 0.0  ;;  %v2731_v52 = vmul.f32 %v4862_v21, %v2631_v36 }
 0x2bc   : > { %v2546_v10 = vadd.f32 %v4859_v14, %v2545_v5  ;;  %v2626_v12 = vadd.f32 %v4859_v14, %v2625_v30 }
 0x2bd   : > { %v2747_v34 = vsel %vm2682_vm15, %v2551_v26, %v2715_v41  ;;  %v2763_v23 = vsel %vm2698_vm12, %v2631_v36, %v2731_v52 }
 0x2be   : > { %2779 = vst.msk [vmem:[%s4869_s29 + $0x38] sm:$0xff] %vm5603_vm5, %v2747_v34  ;;  %vm2681_vm13 = vcmp.ge.f32.partialorder %v2546_v10, 0.0  ;;  %v2714_v16 = vmul.f32 %v4862_v21, %v2546_v10  ;;  %vm2697_vm11 = vcmp.ge.f32.partialorder %v2626_v12, 0.0  ;;  %v2730_v0 = vmul.f32 %v4862_v21, %v2626_v12  ;;  %vm5611_vm5 = vmmov %vm5606_vm0 }
 0x2bf   : > { %2795 = vst.msk [vmem:[%s4869_s29 + $0xb8] sm:$0xff] %vm5604_vm3, %v2763_v23  ;;  %vm5612_vm3 = vmmov %vm5606_vm0 }
 0x2c0   : > { %v2746_v62 = vsel %vm2681_vm13, %v2546_v10, %v2714_v16  ;;  %v2762_v8 = vsel %vm2697_vm11, %v2626_v12, %v2730_v0 }
 0x2c1   : > { %2778 = vst.msk [vmem:[%s4869_s29 + $0x30] sm:$0xff] %vm5605_vm1, %v2746_v62  ;;  %vm5613_vm1 = vmmov %vm5606_vm0 }
 0x2c2   : > { %2794 = vst.msk [vmem:[%s4869_s29 + $0xb0] sm:$0xff] %vm5606_vm0, %v2762_v8 }
 0x2db   : > { %v2976_v60 = vpop.f32.mrf.mxu0  ;;  %v3000_v28 = vpop.f32.mrf.mxu1 }
 0x2dc   : > { %v2561_v17 = vadd.f32 %v2976_v60, %v4859_v14  ;;  %v2641_v35 = vadd.f32 %v3000_v28, %v4859_v14 }
 0x2dd   : > { %v2555_v53 = vpop.f32.mrf.mxu0  ;;  %v2635_v7 = vpop.f32.mrf.mxu1 }
 0x2de   : > { %vm2684_vm4 = vcmp.ge.f32.partialorder %v2561_v17, 0.0  ;;  %v2717_v33 = vmul.f32 %v4862_v21, %v2561_v17  ;;  %vm2700_vm9 = vcmp.ge.f32.partialorder %v2641_v35, 0.0  ;;  %v2733_v3 = vmul.f32 %v4862_v21, %v2641_v35 }
 0x2df   : > { %v2556_v25 = vadd.f32 %v4859_v14, %v2555_v53  ;;  %v2636_v27 = vadd.f32 %v4859_v14, %v2635_v7 }
 0x2e0   : > { %v2749_v46 = vsel %vm2684_vm4, %v2561_v17, %v2717_v33  ;;  %v2765_v37 = vsel %vm2700_vm9, %v2641_v35, %v2733_v3 }
 0x2e1   : > { %2781 = vst.msk [vmem:[%s4869_s29 + $0x48] sm:$0xff] %vm5607_vm8, %v2749_v46  ;;  %vm2683_vm10 = vcmp.ge.f32.partialorder %v2556_v25, 0.0  ;;  %v2716_v13 = vmul.f32 %v4862_v21, %v2556_v25  ;;  %vm2699_vm2 = vcmp.ge.f32.partialorder %v2636_v27, 0.0  ;;  %v2732_v32 = vmul.f32 %v4862_v21, %v2636_v27  ;;  %vm5614_vm8 = vmmov %vm5606_vm0 }
 0x2e2   : > { %2797 = vst.msk [vmem:[%s4869_s29 + $0xc8] sm:$0xff] %vm5608_vm6, %v2765_v37  ;;  %vm5615_vm6 = vmmov %vm5606_vm0 }
 0x2e3   : > { %v2748_v40 = vsel %vm2683_vm10, %v2556_v25, %v2716_v13  ;;  %v2764_v47 = vsel %vm2699_vm2, %v2636_v27, %v2732_v32 }
 0x2e4   : > { %2780 = vst.msk [vmem:[%s4869_s29 + $0x40] sm:$0xff] %vm5609_vm7, %v2748_v40  ;;  %vm5616_vm7 = vmmov %vm5606_vm0 }
 0x2e5   : > { %2796 = vst.msk [vmem:[%s4869_s29 + $0xc0] sm:$0xff] %vm5610_vm14, %v2764_v47  ;;  %vm5617_vm14 = vmmov %vm5606_vm0 }
 0x2ff   : > { %v2979_v58 = vpop.f32.mrf.mxu0  ;;  %v3003_v49 = vpop.f32.mrf.mxu1 }
 0x300   : > { %v2571_v55 = vadd.f32 %v2979_v58, %v4859_v14  ;;  %v2651_v42 = vadd.f32 %v3003_v49, %v4859_v14 }
 0x301   : > { %v2565_v43 = vpop.f32.mrf.mxu0  ;;  %v2645_v18 = vpop.f32.mrf.mxu1 }
 0x302   : > { %vm2686_vm15 = vcmp.ge.f32.partialorder %v2571_v55, 0.0  ;;  %v2719_v6 = vmul.f32 %v4862_v21, %v2571_v55  ;;  %vm2702_vm12 = vcmp.ge.f32.partialorder %v2651_v42, 0.0  ;;  %v2735_v61 = vmul.f32 %v4862_v21, %v2651_v42 }
 0x303   : > { %v2566_v4 = vadd.f32 %v4859_v14, %v2565_v43  ;;  %v2646_v19 = vadd.f32 %v4859_v14, %v2645_v18 }
 0x304   : > { %v2751_v15 = vsel %vm2686_vm15, %v2571_v55, %v2719_v6  ;;  %v2767_v63 = vsel %vm2702_vm12, %v2651_v42, %v2735_v61 }
 0x305   : > { %2783 = vst.msk [vmem:[%s4869_s29 + $0x58] sm:$0xff] %vm5611_vm5, %v2751_v15  ;;  %vm2685_vm13 = vcmp.ge.f32.partialorder %v2566_v4, 0.0  ;;  %v2718_v22 = vmul.f32 %v4862_v21, %v2566_v4  ;;  %vm2701_vm11 = vcmp.ge.f32.partialorder %v2646_v19, 0.0  ;;  %v2734_v20 = vmul.f32 %v4862_v21, %v2646_v19  ;;  %vm5618_vm5 = vmmov %vm5606_vm0 }
 0x306   : > { %2799 = vst.msk [vmem:[%s4869_s29 + $0xd8] sm:$0xff] %vm5612_vm3, %v2767_v63  ;;  %vm5619_vm3 = vmmov %vm5606_vm0 }
 0x307   : > { %v2750_v45 = vsel %vm2685_vm13, %v2566_v4, %v2718_v22  ;;  %v2766_v31 = vsel %vm2701_vm11, %v2646_v19, %v2734_v20 }
 0x308   : > { %2782 = vst.msk [vmem:[%s4869_s29 + $0x50] sm:$0xff] %vm5613_vm1, %v2750_v45  ;;  %vm5620_vm1 = vmmov %vm5606_vm0 }
 0x309   : > { %2798 = vst.msk [vmem:[%s4869_s29 + $0xd0] sm:$0xff] %vm5606_vm0, %v2766_v31 }
 0x327   : > { %v2982_v2 = vpop.f32.mrf.mxu0  ;;  %v3006_v39 = vpop.f32.mrf.mxu1 }
 0x328   : > { %v2581_v54 = vadd.f32 %v2982_v2, %v4859_v14  ;;  %v2661_v56 = vadd.f32 %v3006_v39, %v4859_v14 }
 0x329   : > { %v2575_v1 = vpop.f32.mrf.mxu0  ;;  %v2655_v9 = vpop.f32.mrf.mxu1 }
 0x32a   : > { %vm2688_vm4 = vcmp.ge.f32.partialorder %v2581_v54, 0.0  ;;  %v2721_v24 = vmul.f32 %v4862_v21, %v2581_v54  ;;  %vm2704_vm9 = vcmp.ge.f32.partialorder %v2661_v56, 0.0  ;;  %v2737_v48 = vmul.f32 %v4862_v21, %v2661_v56 }
 0x32b   : > { %v2576_v29 = vadd.f32 %v4859_v14, %v2575_v1  ;;  %v2656_v38 = vadd.f32 %v4859_v14, %v2655_v9 }
 0x32c   : > { %v2753_v44 = vsel %vm2688_vm4, %v2581_v54, %v2721_v24  ;;  %v2769_v50 = vsel %vm2704_vm9, %v2661_v56, %v2737_v48 }
 0x32d   : > { %2785 = vst.msk [vmem:[%s4869_s29 + $0x68] sm:$0xff] %vm5614_vm8, %v2753_v44  ;;  %vm2687_vm10 = vcmp.ge.f32.partialorder %v2576_v29, 0.0  ;;  %v2720_v59 = vmul.f32 %v4862_v21, %v2576_v29  ;;  %vm2703_vm2 = vcmp.ge.f32.partialorder %v2656_v38, 0.0  ;;  %v2736_v57 = vmul.f32 %v4862_v21, %v2656_v38 }
 0x32e   : > { %2801 = vst.msk [vmem:[%s4869_s29 + $0xe8] sm:$0xff] %vm5615_vm6, %v2769_v50 }
 0x32f   : > { %v2752_v11 = vsel %vm2687_vm10, %v2576_v29, %v2720_v59  ;;  %v2768_v51 = vsel %vm2703_vm2, %v2656_v38, %v2736_v57 }
 0x330   : > { %2784 = vst.msk [vmem:[%s4869_s29 + $0x60] sm:$0xff] %vm5616_vm7, %v2752_v11 }
 0x331   : > { %2800 = vst.msk [vmem:[%s4869_s29 + $0xe0] sm:$0xff] %vm5617_vm14, %v2768_v51 }
 0x343   : > { %v2985_v26 = vpop.f32.mrf.mxu0  ;;  %v3009_v36 = vpop.f32.mrf.mxu1 }
 0x344   : > { %v2591_v5 = vadd.f32 %v2985_v26, %v4859_v14  ;;  %v2671_v30 = vadd.f32 %v3009_v36, %v4859_v14 }
 0x345   : > { %v2585_v41 = vpop.f32.mrf.mxu0  ;;  %v2665_v52 = vpop.f32.mrf.mxu1 }
 0x346   : > { %vm2690_vm15 = vcmp.ge.f32.partialorder %v2591_v5, 0.0  ;;  %v2723_v10 = vmul.f32 %v4862_v21, %v2591_v5  ;;  %vm2706_vm12 = vcmp.ge.f32.partialorder %v2671_v30, 0.0  ;;  %v2739_v12 = vmul.f32 %v4862_v21, %v2671_v30 }
 0x347   : > { %v2586_v34 = vadd.f32 %v4859_v14, %v2585_v41  ;;  %v2666_v23 = vadd.f32 %v4859_v14, %v2665_v52 }
 0x348   : > { %v2755_v16 = vsel %vm2690_vm15, %v2591_v5, %v2723_v10  ;;  %v2771_v0 = vsel %vm2706_vm12, %v2671_v30, %v2739_v12 }
 0x349   : > { %2787 = vst.msk [vmem:[%s4869_s29 + $0x78] sm:$0xff] %vm5618_vm5, %v2755_v16  ;;  %vm2689_vm13 = vcmp.ge.f32.partialorder %v2586_v34, 0.0  ;;  %v2722_v62 = vmul.f32 %v4862_v21, %v2586_v34  ;;  %vm2705_vm11 = vcmp.ge.f32.partialorder %v2666_v23, 0.0  ;;  %v2738_v8 = vmul.f32 %v4862_v21, %v2666_v23 }
 0x34a   : > { %2803 = vst.msk [vmem:[%s4869_s29 + $0xf8] sm:$0xff] %vm5619_vm3, %v2771_v0 }
 0x34b   : > { %v2754_v60 = vsel %vm2689_vm13, %v2586_v34, %v2722_v62  ;;  %v2770_v28 = vsel %vm2705_vm11, %v2666_v23, %v2738_v8 }
 0x34c   : > { %2786 = vst.msk [vmem:[%s4869_s29 + $0x70] sm:$0xff] %vm5620_vm1, %v2754_v60 }
 0x34d   : > { %2802 = vst.msk [vmem:[%s4869_s29 + $0xf0] sm:$0xff] %vm5606_vm0, %v2770_v28 }
 0x34e PF: > { %s15_s17 = sadd.s32 1, %s3104_s17  }
 0x34f   : > { %p12_p4 = scmp.ge.s32.totalorder %s15_s17, 4  }
 0x351   :  { %14 = sbr.rel (!%p12_p4) target bundleno = 2 (0x2), region = 66 }

</bundles_post_ra>
